<compile_context>
chip_gen: v5e
topology: v5e:2x2
jax: 0.10.0
libtpu: 0.0.40
codegen_flags: <defaults>
</compile_context>

<pallas_src>
import functools

import jax
import jax.numpy as jnp
from jax.experimental import pallas as pl
from jax.experimental.pallas import tpu as pltpu

LANE = 128  # TPU lane width; all channel dims are padded to multiples of this.


# ----------------------------- Pallas kernel -------------------------------


def _fused_multisage_kernel(
    a_ref,       # (N, N)                int8   adjacency edge counts A[dst, src]
    invdeg_ref,  # (N, 1)                f32    1 / max(deg, 1) per destination
    x_ref,       # (N, 128)              f32    input features, lane-padded
    w_ref,       # (1, 256, 128)         bf16   stacked [W_l ; W_r] for layer l
    b_ref,       # (1, 1, 128)           f32    layer bias (lane-padded)
    wh_ref,      # (n_blocks, 128, 128)  bf16   head weight, one 128-row chunk / block
    bh_ref,      # (1, 128)              f32    head bias (lane-padded)
    h_out_ref,   # (1, N, 128)           f32    this layer's output features
    logits_ref,  # (N, 128)              f32    logits (lane-padded)
    hcat_scr,    # (n_blocks, N, 128)    bf16   VMEM concat features (head input)
    *,
    n_layers,
):
    l = pl.program_id(0)          # layer index; the only (sequential) grid axis
    n = x_ref.shape[0]

    # ---- one-time init: block 0 of the concat scratch <- x (bf16) -----------
    @pl.when(l == 0)
    def _init():
        hcat_scr[0] = x_ref[...].astype(jnp.bfloat16)

    h_cur = hcat_scr[l]           # (N, 128) bf16, current layer input

    # ---- mean aggregation: one MXU matmul over the resident adjacency, -----
    # ---- 1/deg row scale applied once to the f32 result. --------------------
    agg = jnp.dot(a_ref[...].astype(jnp.bfloat16), h_cur,
                  preferred_element_type=jnp.float32) * invdeg_ref[...]

    # ---- fused SAGE projection: [agg | h] @ [W_l ; W_r] (K=256) + bias ------
    stacked = jnp.concatenate([agg.astype(jnp.bfloat16), h_cur], axis=-1)
    h_next = jnp.dot(stacked, w_ref[0],
                     preferred_element_type=jnp.float32) + b_ref[0]

    h_out_ref[0] = h_next                           # lane-dense HBM writeback (pipelined)
    hcat_scr[l + 1] = h_next.astype(jnp.bfloat16)   # next layer / head input

    # ---- final linear head on the VMEM-resident concatenated features ------
    @pl.when(l == n_layers - 1)
    def _head():
        acc = jnp.zeros((n, LANE), jnp.float32)
        for blk in range(n_layers + 1):             # static unroll; K=128 each
            acc += jnp.dot(hcat_scr[blk], wh_ref[blk],
                           preferred_element_type=jnp.float32)
        logits_ref[...] = acc + bh_ref[...]


def multisage_fused_call(a_counts, inv_deg, x_pad, w_stack, b_stack,
                         w_head, b_head, *, n_layers):
    """Single pallas_call running the full layer stack + concat + head."""
    n = x_pad.shape[0]
    n_blocks = n_layers + 1

    # Scoped-VMEM budget from the actual footprint (x2 headroom), capped well
    # below v7x's 64 MiB physical VMEM.
    est = (n * n                          # A int8 (resident)
           + n * LANE * 4                 # x
           + n * 4                        # inv_deg
           + n_blocks * n * LANE * 2      # hcat scratch (bf16)
           + 2 * n * LANE * 4             # per-layer output block (double-buffered)
           + n * LANE * 4                 # logits
           + n_layers * (2 * LANE * LANE * 2 + LANE * 4)   # layer weights/bias
           + n_blocks * LANE * LANE * 2 + LANE * 4)        # head weights/bias
    vmem_limit = min(48 * 1024 * 1024, max(8 * 1024 * 1024, 2 * est))

    kernel = functools.partial(_fused_multisage_kernel, n_layers=n_layers)

    return pl.pallas_call(
        kernel,
        out_shape=(
            jax.ShapeDtypeStruct((n_layers, n, LANE), jnp.float32),  # per-layer feats
            jax.ShapeDtypeStruct((n, LANE), jnp.float32),            # logits (padded)
        ),
        grid_spec=pltpu.PrefetchScalarGridSpec(
            num_scalar_prefetch=0,
            grid=(n_layers,),
            in_specs=[
                pl.BlockSpec((n, n), lambda l: (0, 0)),                  # A (resident)
                pl.BlockSpec((n, 1), lambda l: (0, 0)),                  # 1/deg
                pl.BlockSpec((n, LANE), lambda l: (0, 0)),               # x (resident)
                pl.BlockSpec((1, 2 * LANE, LANE), lambda l: (l, 0, 0)),  # layer W
                pl.BlockSpec((1, 1, LANE), lambda l: (l, 0, 0)),         # layer b
                pl.BlockSpec((n_blocks, LANE, LANE), lambda l: (0, 0, 0)),  # head W
                pl.BlockSpec((1, LANE), lambda l: (0, 0)),               # head b
            ],
            out_specs=(
                pl.BlockSpec((1, n, LANE), lambda l: (l, 0, 0)),
                pl.BlockSpec((n, LANE), lambda l: (0, 0)),
            ),
            scratch_shapes=[
                pltpu.VMEM((n_blocks, n, LANE), jnp.bfloat16),   # concat (head input)
            ],
        ),
        compiler_params=pltpu.CompilerParams(
            dimension_semantics=("arbitrary",),
            vmem_limit_bytes=vmem_limit,
        ),
    )(a_counts, inv_deg, x_pad, w_stack, b_stack, w_head, b_head)


# ------------------------------- glue (JAX) --------------------------------


def build_adj_counts(edge_index, n):
    """Dense int8 edge-count adjacency + per-destination 1/deg (f32).

    A[dst, src] = #(src -> dst) edges; mean aggregation = (A @ h) * inv_deg.
    """
    src = edge_index[0]
    dst = edge_index[1]
    counts = jnp.zeros((n, n), jnp.float32).at[dst, src].add(1.0)
    deg = counts.sum(axis=1, keepdims=True)
    inv_deg = 1.0 / jnp.maximum(deg, 1.0)
    # TODO(synk): int8 saturates at 127 duplicate edges per (dst, src) pair.
    return jnp.minimum(counts, 127.0).astype(jnp.int8), inv_deg


def init_multisage_params(key, in_channels, out_channels, n_classes,
                          n_layers=3, cat=True):
    params = {"layers": []}
    c_in = in_channels
    for _ in range(n_layers):
        key, k1, k2, k3 = jax.random.split(key, 4)
        w_l = 0.1 * jax.random.normal(k1, (c_in, out_channels), jnp.float32)
        w_r = 0.1 * jax.random.normal(k2, (c_in, out_channels), jnp.float32)
        b = 0.1 * jax.random.normal(k3, (out_channels,), jnp.float32)
        params["layers"].append((w_l, w_r, b))
        c_in = out_channels
    head_in = in_channels + out_channels * n_layers if cat else out_channels
    key, k1, k2 = jax.random.split(key, 3)
    params["lin_w"] = 0.1 * jax.random.normal(k1, (head_in, n_classes), jnp.float32)
    params["lin_b"] = 0.1 * jax.random.normal(k2, (n_classes,), jnp.float32)
    return params


def pack_params(params, in_channels, out_channels, n_layers, n_classes, cat=True):
    """Pad / stack weights into the lane-aligned layout the kernel expects."""
    w_stack = jnp.zeros((n_layers, 2 * LANE, LANE), jnp.float32)
    b_stack = jnp.zeros((n_layers, 1, LANE), jnp.float32)
    for layer, (w_l, w_r, b) in enumerate(params["layers"]):
        c_in, c_out = w_l.shape
        w_stack = w_stack.at[layer, 0:c_in, 0:c_out].set(w_l)             # agg branch
        w_stack = w_stack.at[layer, LANE:LANE + c_in, 0:c_out].set(w_r)   # self branch
        b_stack = b_stack.at[layer, 0, 0:c_out].set(b)

    n_blocks = n_layers + 1
    w_head = jnp.zeros((n_blocks, LANE, LANE), jnp.float32)
    b_head = jnp.zeros((1, LANE), jnp.float32)
    lin_w, lin_b = params["lin_w"], params["lin_b"]
    if cat:
        widths = [in_channels] + [out_channels] * n_layers
        row = 0
        for blk, w in enumerate(widths):
            w_head = w_head.at[blk, 0:w, 0:n_classes].set(lin_w[row:row + w])
            row += w
    else:
        w_head = w_head.at[n_layers, 0:out_channels, 0:n_classes].set(lin_w)
    b_head = b_head.at[0, 0:n_classes].set(lin_b)

    return dict(
        w_stack=w_stack.astype(jnp.bfloat16),
        b_stack=b_stack,
        w_head=w_head.astype(jnp.bfloat16),
        b_head=b_head,
    )


def multisage_forward(params, packed, x, edge_index,
                      x_masked=None, edge_index_masked=None, cat=True):
    n_layers = len(params["layers"])
    in_channels = x.shape[1]
    out_channels = params["layers"][0][0].shape[1]
    n_classes = params["lin_w"].shape[1]

    def run_stack(feat, ei):
        n = feat.shape[0]
        a_counts, inv_deg = build_adj_counts(ei, n)
        x_pad = jnp.zeros((n, LANE), jnp.float32).at[:, :in_channels].set(feat)
        h_layers, logits_pad = multisage_fused_call(
            a_counts, inv_deg, x_pad, packed["w_stack"], packed["b_stack"],
            packed["w_head"], packed["b_head"], n_layers=n_layers)
        if cat:
            pieces = [feat] + [h_layers[layer, :, :out_channels]
                               for layer in range(n_layers)]
            h = jnp.concatenate(pieces, axis=-1)
        else:
            h = h_layers[n_layers - 1, :, :out_channels]
        return logits_pad[:, :n_classes], h

    logits_un, h_unmasked = run_stack(x, edge_index)
    if x_masked is not None and edge_index_masked is not None:
        logits_m, _ = run_stack(x_masked, edge_index_masked)
        return logits_m, h_unmasked
    return logits_un, h_unmasked


# --------------------------- pure-JAX reference ----------------------------


def multisage_reference(params, x, edge_index, cat=True):
    """Mirrors the kernel's numerics (int8 counts, bf16 operands, f32 acc)."""
    n = x.shape[0]
    counts, inv_deg = build_adj_counts(edge_index, n)
    a = counts.astype(jnp.bfloat16)
    xs = [x]
    h = x
    for (w_l, w_r, b) in params["layers"]:
        agg = jnp.dot(a, h.astype(jnp.bfloat16),
                      preferred_element_type=jnp.float32) * inv_deg
        h = (jnp.dot(agg.astype(jnp.bfloat16), w_l.astype(jnp.bfloat16),
                     preferred_element_type=jnp.float32)
             + jnp.dot(h.astype(jnp.bfloat16), w_r.astype(jnp.bfloat16),
                       preferred_element_type=jnp.float32)
             + b)
        xs.append(h)
    hcat = jnp.concatenate(xs, axis=-1) if cat else xs[-1]
    logits = jnp.dot(hcat.astype(jnp.bfloat16), params["lin_w"].astype(jnp.bfloat16),
                     preferred_element_type=jnp.float32) + params["lin_b"]
    return logits, hcat


# --------------------------------- main -------------------------------------


if __name__ == "__main__":
    N_NODES = 256
    IN_CHANNELS = 16
    OUT_CHANNELS = 32
    N_CLASSES = 4
    N_LAYERS = 3
    N_EDGES = 1024

    key = jax.random.PRNGKey(0)
    key, kx, ksrc, kdst, kparams = jax.random.split(key, 5)

    x = jax.random.normal(kx, (N_NODES, IN_CHANNELS), jnp.float32)
    src = jax.random.randint(ksrc, (N_EDGES,), 0, N_NODES, dtype=jnp.int32)
    dst = jax.random.randint(kdst, (N_EDGES,), 0, N_NODES, dtype=jnp.int32)
    edge_index = jnp.stack([src, dst], axis=0)  # [2, E]

    params = init_multisage_params(
        kparams, IN_CHANNELS, OUT_CHANNELS, N_CLASSES, n_layers=N_LAYERS, cat=True)
    packed = pack_params(params, IN_CHANNELS, OUT_CHANNELS, N_LAYERS, N_CLASSES, cat=True)

    # ---- unmasked path ----
    logits, h_unmasked = multisage_forward(params, packed, x, edge_index, cat=True)
    jax.block_until_ready((logits, h_unmasked))

    assert logits.shape == (N_NODES, N_CLASSES)
    assert h_unmasked.shape == (N_NODES, IN_CHANNELS + OUT_CHANNELS * N_LAYERS)

    ref_logits, ref_h = multisage_reference(params, x, edge_index, cat=True)
    err_logits = float(jnp.max(jnp.abs(logits - ref_logits)))
    err_h = float(jnp.max(jnp.abs(h_unmasked - ref_h)))
    assert err_logits < 5e-2 and err_h < 5e-2, (err_logits, err_h)

    # ---- masked path (logits from masked graph, features from unmasked) ----
    edge_index_masked = edge_index[:, : N_EDGES // 2]
    logits_m, h_unm2 = multisage_forward(
        params, packed, x, edge_index, x_masked=x,
        edge_index_masked=edge_index_masked, cat=True)
    jax.block_until_ready((logits_m, h_unm2))
    ref_logits_m, _ = multisage_reference(params, x, edge_index_masked, cat=True)
    assert logits_m.shape == (N_NODES, N_CLASSES)
    assert float(jnp.max(jnp.abs(logits_m - ref_logits_m))) < 5e-2
    assert float(jnp.max(jnp.abs(h_unm2 - ref_h))) < 5e-2

    print("KERNEL_OK")
</pallas_src>

<mosaic_0001>
module attributes {stable_mosaic.version = 11 : i64} {
  func.func @_fused_multisage_kernel(%arg0: i32, %arg1: memref<256x256xi8, #tpu.memory_space<vmem>>, %arg2: memref<256x1xf32, #tpu.memory_space<vmem>>, %arg3: memref<256x128xf32, #tpu.memory_space<vmem>>, %arg4: memref<1x256x128xbf16, #tpu.memory_space<vmem>>, %arg5: memref<1x1x128xf32, #tpu.memory_space<vmem>>, %arg6: memref<4x128x128xbf16, #tpu.memory_space<vmem>>, %arg7: memref<1x128xf32, #tpu.memory_space<vmem>>, %arg8: memref<1x256x128xf32, #tpu.memory_space<vmem>>, %arg9: memref<256x128xf32, #tpu.memory_space<vmem>>, %arg10: memref<4x256x128xbf16, #tpu.memory_space<vmem>>) attributes {dimension_semantics = [#tpu.dimension_semantics<arbitrary>], iteration_bounds = array<i64: 3>, scalar_prefetch = 0 : i64, scratch_operands = 1 : i64, tpu.core_type = #tpu.core_type<tc>, window_params = [{pipeline_mode = #tpu.pipeline_mode<synchronous>, transform_indices = @transform_0, window_bounds = array<i64: 256, 256>}, {pipeline_mode = #tpu.pipeline_mode<synchronous>, transform_indices = @transform_1, window_bounds = array<i64: 256, 1>}, {pipeline_mode = #tpu.pipeline_mode<synchronous>, transform_indices = @transform_2, window_bounds = array<i64: 256, 128>}, {transform_indices = @transform_3, window_bounds = array<i64: 1, 256, 128>}, {transform_indices = @transform_4, window_bounds = array<i64: 1, 1, 128>}, {pipeline_mode = #tpu.pipeline_mode<synchronous>, transform_indices = @transform_5, window_bounds = array<i64: 4, 128, 128>}, {pipeline_mode = #tpu.pipeline_mode<synchronous>, transform_indices = @transform_6, window_bounds = array<i64: 1, 128>}, {transform_indices = @transform_7, window_bounds = array<i64: 1, 256, 128>}, {pipeline_mode = #tpu.pipeline_mode<synchronous>, transform_indices = @transform_8, window_bounds = array<i64: 256, 128>}]} {
    %c0_i32 = arith.constant 0 : i32
    %0 = arith.cmpi eq, %arg0, %c0_i32 : i32
    %1 = arith.extui %0 : i1 to i32
    %c0_i32_0 = arith.constant 0 : i32
    %2 = arith.cmpi ne, %1, %c0_i32_0 : i32
    scf.if %2 {
      %c0_19 = arith.constant 0 : index
      %c0_20 = arith.constant 0 : index
      %33 = vector.load %arg3[%c0_19, %c0_20] : memref<256x128xf32, #tpu.memory_space<vmem>>, vector<256x128xf32>
      %34 = arith.truncf %33 : vector<256x128xf32> to vector<256x128xbf16>
      %c0_21 = arith.constant 0 : index
      %c0_22 = arith.constant 0 : index
      %c0_23 = arith.constant 0 : index
      %35 = vector.load %arg10[%c0_21, %c0_22, %c0_23] : memref<4x256x128xbf16, #tpu.memory_space<vmem>>, vector<1x256x128xbf16>
      %36 = vector.shape_cast %35 : vector<1x256x128xbf16> to vector<256x128xbf16>
      %37 = vector.shape_cast %34 : vector<256x128xbf16> to vector<1x256x128xbf16>
      tpu.vector_store %arg10[%c0_21, %c0_22, %c0_23], %37 {strides = array<i32>} : memref<4x256x128xbf16, #tpu.memory_space<vmem>>, vector<1x256x128xbf16>,
    } else {
    }
    %3 = arith.index_cast %arg0 : i32 to index
    %c0 = arith.constant 0 : index
    %c0_1 = arith.constant 0 : index
    %4 = vector.load %arg10[%3, %c0, %c0_1] : memref<4x256x128xbf16, #tpu.memory_space<vmem>>, vector<1x256x128xbf16>
    %5 = vector.shape_cast %4 : vector<1x256x128xbf16> to vector<256x128xbf16>
    %c0_2 = arith.constant 0 : index
    %c0_3 = arith.constant 0 : index
    %6 = vector.load %arg1[%c0_2, %c0_3] : memref<256x256xi8, #tpu.memory_space<vmem>>, vector<256x256xi8>
    %7 = arith.sitofp %6 : vector<256x256xi8> to vector<256x256xbf16>
    %cst = arith.constant dense<0.000000e+00> : vector<256x128xf32>
    %8 = tpu.matmul %7, %5, %cst {dimension_numbers = #tpu.dot_dimension_numbers<[1], [0], [0], [1], [0, 0, 1, 1], [], []>} : vector<256x256xbf16>, vector<256x128xbf16>, vector<256x128xf32> -> vector<256x128xf32>
    %c0_4 = arith.constant 0 : index
    %c0_5 = arith.constant 0 : index
    %9 = vector.load %arg2[%c0_4, %c0_5] : memref<256x1xf32, #tpu.memory_space<vmem>>, vector<256x1xf32>
    %10 = vector.broadcast %9 : vector<256x1xf32> to vector<256x128xf32>
    %11 = arith.mulf %8, %10 : vector<256x128xf32>
    %12 = arith.truncf %11 : vector<256x128xf32> to vector<256x128xbf16>
    %13 = tpu.concatenate %12, %5 in 1 : vector<256x128xbf16>, vector<256x128xbf16> -> vector<256x256xbf16>
    %c0_6 = arith.constant 0 : index
    %c0_7 = arith.constant 0 : index
    %c0_8 = arith.constant 0 : index
    %14 = vector.load %arg4[%c0_6, %c0_7, %c0_8] : memref<1x256x128xbf16, #tpu.memory_space<vmem>>, vector<1x256x128xbf16>
    %15 = vector.shape_cast %14 : vector<1x256x128xbf16> to vector<256x128xbf16>
    %cst_9 = arith.constant dense<0.000000e+00> : vector<256x128xf32>
    %16 = tpu.matmul %13, %15, %cst_9 {dimension_numbers = #tpu.dot_dimension_numbers<[1], [0], [0], [1], [0, 0, 1, 1], [], []>} : vector<256x256xbf16>, vector<256x128xbf16>, vector<256x128xf32> -> vector<256x128xf32>
    %c0_10 = arith.constant 0 : index
    %c0_11 = arith.constant 0 : index
    %c0_12 = arith.constant 0 : index
    %17 = vector.load %arg5[%c0_10, %c0_11, %c0_12] : memref<1x1x128xf32, #tpu.memory_space<vmem>>, vector<1x1x128xf32>
    %18 = vector.shape_cast %17 : vector<1x1x128xf32> to vector<1x128xf32>
    %19 = vector.broadcast %18 : vector<1x128xf32> to vector<256x128xf32>
    %20 = arith.addf %16, %19 : vector<256x128xf32>
    %c0_13 = arith.constant 0 : index
    %c0_14 = arith.constant 0 : index
    %c0_15 = arith.constant 0 : index
    %21 = vector.load %arg8[%c0_13, %c0_14, %c0_15] : memref<1x256x128xf32, #tpu.memory_space<vmem>>, vector<1x256x128xf32>
    %22 = vector.shape_cast %21 : vector<1x256x128xf32> to vector<256x128xf32>
    %23 = vector.shape_cast %20 : vector<256x128xf32> to vector<1x256x128xf32>
    tpu.vector_store %arg8[%c0_13, %c0_14, %c0_15], %23 {strides = array<i32>} : memref<1x256x128xf32, #tpu.memory_space<vmem>>, vector<1x256x128xf32>,
    %24 = arith.truncf %20 : vector<256x128xf32> to vector<256x128xbf16>
    %c1_i32 = arith.constant 1 : i32
    %25 = arith.addi %arg0, %c1_i32 : i32
    %26 = arith.index_cast %25 : i32 to index
    %c0_16 = arith.constant 0 : index
    %c0_17 = arith.constant 0 : index
    %27 = vector.load %arg10[%26, %c0_16, %c0_17] : memref<4x256x128xbf16, #tpu.memory_space<vmem>>, vector<1x256x128xbf16>
    %28 = vector.shape_cast %27 : vector<1x256x128xbf16> to vector<256x128xbf16>
    %29 = vector.shape_cast %24 : vector<256x128xbf16> to vector<1x256x128xbf16>
    tpu.vector_store %arg10[%26, %c0_16, %c0_17], %29 {strides = array<i32>} : memref<4x256x128xbf16, #tpu.memory_space<vmem>>, vector<1x256x128xbf16>,
    %c2_i32 = arith.constant 2 : i32
    %30 = arith.cmpi eq, %arg0, %c2_i32 : i32
    %31 = arith.extui %30 : i1 to i32
    %c0_i32_18 = arith.constant 0 : i32
    %32 = arith.cmpi ne, %31, %c0_i32_18 : i32
    scf.if %32 {
      %cst_19 = arith.constant 0.000000e+00 : f32
      %33 = vector.broadcast %cst_19 : f32 to vector<256x128xf32>
      %c0_20 = arith.constant 0 : index
      %c0_21 = arith.constant 0 : index
      %c0_22 = arith.constant 0 : index
      %34 = vector.load %arg10[%c0_20, %c0_21, %c0_22] : memref<4x256x128xbf16, #tpu.memory_space<vmem>>, vector<1x256x128xbf16>
      %35 = vector.shape_cast %34 : vector<1x256x128xbf16> to vector<256x128xbf16>
      %c0_23 = arith.constant 0 : index
      %c0_24 = arith.constant 0 : index
      %c0_25 = arith.constant 0 : index
      %36 = vector.load %arg6[%c0_23, %c0_24, %c0_25] : memref<4x128x128xbf16, #tpu.memory_space<vmem>>, vector<1x128x128xbf16>
      %37 = vector.shape_cast %36 : vector<1x128x128xbf16> to vector<128x128xbf16>
      %cst_26 = arith.constant dense<0.000000e+00> : vector<256x128xf32>
      %38 = tpu.matmul %35, %37, %cst_26 {dimension_numbers = #tpu.dot_dimension_numbers<[1], [0], [0], [1], [0, 0, 1, 1], [], []>} : vector<256x128xbf16>, vector<128x128xbf16>, vector<256x128xf32> -> vector<256x128xf32>
      %39 = arith.addf %33, %38 : vector<256x128xf32>
      %c1 = arith.constant 1 : index
      %c0_27 = arith.constant 0 : index
      %c0_28 = arith.constant 0 : index
      %40 = vector.load %arg10[%c1, %c0_27, %c0_28] : memref<4x256x128xbf16, #tpu.memory_space<vmem>>, vector<1x256x128xbf16>
      %41 = vector.shape_cast %40 : vector<1x256x128xbf16> to vector<256x128xbf16>
      %c1_29 = arith.constant 1 : index
      %c0_30 = arith.constant 0 : index
      %c0_31 = arith.constant 0 : index
      %42 = vector.load %arg6[%c1_29, %c0_30, %c0_31] : memref<4x128x128xbf16, #tpu.memory_space<vmem>>, vector<1x128x128xbf16>
      %43 = vector.shape_cast %42 : vector<1x128x128xbf16> to vector<128x128xbf16>
      %cst_32 = arith.constant dense<0.000000e+00> : vector<256x128xf32>
      %44 = tpu.matmul %41, %43, %cst_32 {dimension_numbers = #tpu.dot_dimension_numbers<[1], [0], [0], [1], [0, 0, 1, 1], [], []>} : vector<256x128xbf16>, vector<128x128xbf16>, vector<256x128xf32> -> vector<256x128xf32>
      %45 = arith.addf %39, %44 : vector<256x128xf32>
      %c2 = arith.constant 2 : index
      %c0_33 = arith.constant 0 : index
      %c0_34 = arith.constant 0 : index
      %46 = vector.load %arg10[%c2, %c0_33, %c0_34] : memref<4x256x128xbf16, #tpu.memory_space<vmem>>, vector<1x256x128xbf16>
      %47 = vector.shape_cast %46 : vector<1x256x128xbf16> to vector<256x128xbf16>
      %c2_35 = arith.constant 2 : index
      %c0_36 = arith.constant 0 : index
      %c0_37 = arith.constant 0 : index
      %48 = vector.load %arg6[%c2_35, %c0_36, %c0_37] : memref<4x128x128xbf16, #tpu.memory_space<vmem>>, vector<1x128x128xbf16>
      %49 = vector.shape_cast %48 : vector<1x128x128xbf16> to vector<128x128xbf16>
      %cst_38 = arith.constant dense<0.000000e+00> : vector<256x128xf32>
      %50 = tpu.matmul %47, %49, %cst_38 {dimension_numbers = #tpu.dot_dimension_numbers<[1], [0], [0], [1], [0, 0, 1, 1], [], []>} : vector<256x128xbf16>, vector<128x128xbf16>, vector<256x128xf32> -> vector<256x128xf32>
      %51 = arith.addf %45, %50 : vector<256x128xf32>
      %c3 = arith.constant 3 : index
      %c0_39 = arith.constant 0 : index
      %c0_40 = arith.constant 0 : index
      %52 = vector.load %arg10[%c3, %c0_39, %c0_40] : memref<4x256x128xbf16, #tpu.memory_space<vmem>>, vector<1x256x128xbf16>
      %53 = vector.shape_cast %52 : vector<1x256x128xbf16> to vector<256x128xbf16>
      %c3_41 = arith.constant 3 : index
      %c0_42 = arith.constant 0 : index
      %c0_43 = arith.constant 0 : index
      %54 = vector.load %arg6[%c3_41, %c0_42, %c0_43] : memref<4x128x128xbf16, #tpu.memory_space<vmem>>, vector<1x128x128xbf16>
      %55 = vector.shape_cast %54 : vector<1x128x128xbf16> to vector<128x128xbf16>
      %cst_44 = arith.constant dense<0.000000e+00> : vector<256x128xf32>
      %56 = tpu.matmul %53, %55, %cst_44 {dimension_numbers = #tpu.dot_dimension_numbers<[1], [0], [0], [1], [0, 0, 1, 1], [], []>} : vector<256x128xbf16>, vector<128x128xbf16>, vector<256x128xf32> -> vector<256x128xf32>
      %57 = arith.addf %51, %56 : vector<256x128xf32>
      %c0_45 = arith.constant 0 : index
      %c0_46 = arith.constant 0 : index
      %58 = vector.load %arg7[%c0_45, %c0_46] : memref<1x128xf32, #tpu.memory_space<vmem>>, vector<1x128xf32>
      %59 = vector.broadcast %58 : vector<1x128xf32> to vector<256x128xf32>
      %60 = arith.addf %57, %59 : vector<256x128xf32>
      %c0_47 = arith.constant 0 : index
      %c0_48 = arith.constant 0 : index
      %61 = vector.load %arg9[%c0_47, %c0_48] : memref<256x128xf32, #tpu.memory_space<vmem>>, vector<256x128xf32>
      tpu.vector_store %arg9[%c0_47, %c0_48], %60 {strides = array<i32>} : memref<256x128xf32, #tpu.memory_space<vmem>>, vector<256x128xf32>,
    } else {
    }
    return
  }
  func.func @transform_0(%arg0: i32) -> (i32, i32) {
    %c0_i32 = arith.constant 0 : i32
    %c0_i32_0 = arith.constant 0 : i32
    %c0_i32_1 = arith.constant 0 : i32
    return %c0_i32, %c0_i32_0 : i32, i32
  }
  func.func @transform_1(%arg0: i32) -> (i32, i32) {
    %c0_i32 = arith.constant 0 : i32
    %c0_i32_0 = arith.constant 0 : i32
    %c0_i32_1 = arith.constant 0 : i32
    return %c0_i32, %c0_i32_0 : i32, i32
  }
  func.func @transform_2(%arg0: i32) -> (i32, i32) {
    %c0_i32 = arith.constant 0 : i32
    %c0_i32_0 = arith.constant 0 : i32
    %c0_i32_1 = arith.constant 0 : i32
    return %c0_i32, %c0_i32_0 : i32, i32
  }
  func.func @transform_3(%arg0: i32) -> (i32, i32, i32) {
    %c0_i32 = arith.constant 0 : i32
    %c0_i32_0 = arith.constant 0 : i32
    %c0_i32_1 = arith.constant 0 : i32
    return %arg0, %c0_i32, %c0_i32_0 : i32, i32, i32
  }
  func.func @transform_4(%arg0: i32) -> (i32, i32, i32) {
    %c0_i32 = arith.constant 0 : i32
    %c0_i32_0 = arith.constant 0 : i32
    %c0_i32_1 = arith.constant 0 : i32
    return %arg0, %c0_i32, %c0_i32_0 : i32, i32, i32
  }
  func.func @transform_5(%arg0: i32) -> (i32, i32, i32) {
    %c0_i32 = arith.constant 0 : i32
    %c0_i32_0 = arith.constant 0 : i32
    %c0_i32_1 = arith.constant 0 : i32
    %c0_i32_2 = arith.constant 0 : i32
    return %c0_i32, %c0_i32_0, %c0_i32_1 : i32, i32, i32
  }
  func.func @transform_6(%arg0: i32) -> (i32, i32) {
    %c0_i32 = arith.constant 0 : i32
    %c0_i32_0 = arith.constant 0 : i32
    %c0_i32_1 = arith.constant 0 : i32
    return %c0_i32, %c0_i32_0 : i32, i32
  }
  func.func @transform_7(%arg0: i32) -> (i32, i32, i32) {
    %c0_i32 = arith.constant 0 : i32
    %c0_i32_0 = arith.constant 0 : i32
    %c0_i32_1 = arith.constant 0 : i32
    return %arg0, %c0_i32, %c0_i32_0 : i32, i32, i32
  }
  func.func @transform_8(%arg0: i32) -> (i32, i32) {
    %c0_i32 = arith.constant 0 : i32
    %c0_i32_0 = arith.constant 0 : i32
    %c0_i32_1 = arith.constant 0 : i32
    return %c0_i32, %c0_i32_0 : i32, i32
  }
}

</mosaic_0001>

<bundles_post_ra>
// kernel: tpu_custom_call.1
= control target key start
LH: loop header
LB: loop body
LE: loop exit
PB: predicated region body
PF: predicated region fallthrough
CT: control target
= control target key end

     0   :  { %s4982_s0 = inlined_call_operand.hbm [shape: s8[256,256], index: 0, kind: input, shape index: {}]   ;;  %s4983_s1 = inlined_call_operand.vmem [shape: f32[256,1], index: 1, kind: input, shape index: {}]   ;;  %s4984_s2 = inlined_call_operand.vmem [shape: f32[256,128], index: 2, kind: input, shape index: {}]   ;;  %s4985_s3 = inlined_call_operand.hbm [shape: bf16[3,256,128], index: 3, kind: input, shape index: {}]   ;;  %s4986_s4 = inlined_call_operand.vmem [shape: f32[3,1,128], index: 4, kind: input, shape index: {}]   ;;  %s4987_s5 = inlined_call_operand.hbm [shape: bf16[4,128,128], index: 5, kind: input, shape index: {}]   ;;  %s4988_s6 = inlined_call_operand.vmem [shape: f32[1,128], index: 6, kind: input, shape index: {}]   ;;  %s4989_s7 = inlined_call_operand.hbm [shape: f32[3,256,128], index: 7, kind: output, shape index: {0}]   ;;  %s4990_s8 = inlined_call_operand.hbm [shape: f32[256,128], index: 8, kind: output, shape index: {1}]  }
   0x1   :  { %4994 = sst [smem:[#allocation18_spill]] %s4982_s0 }
   0x2   :  { %4995 = sst [smem:[#allocation19_spill]] %s4987_s5 }
   0x3   :  { %14 = vsyncpa [#allocation4], 0 }
   0x4   :  { %15 = vsyncpa [#allocation7], 0 }
   0x5   :  { %17 = vsyncpa [#allocation7 + $0x1], 0 }
   0x6   :  { %18 = vsyncpa [#allocation5], 0 }
   0x7   :  { %20 = vsyncpa [#allocation5 + $0x1], 0 }
   0x8   :  { %21 = vsyncpa [#allocation11], 0  ;;  %s4369_s27 = smov 0   ;;  %s4371_s28 = smov 0  }
   0x9   :  { %s4373_s29 = smov 0   ;;  %s4375_s30 = smov 0  }
   0xa LB: > { %s4390_s9 = sadd.s32 4294967295, %s4312_s30   ;;  %s3135_s10 = sadd.s32 4294967294, %s4312_s30   ;;  %s4312_s30 = sphi %s4375_s30, %s5014_s30   ;;  %s4308_s29 = sphi %s4373_s29, %s5013_s29   ;;  %s4304_s28 = sphi %s4371_s28, %s5012_s28   ;;  %s4300_s27 = sphi %s4369_s27, %s5011_s27  }
   0xb   : > { %p110_p0 = scmp.ne.s32.totalorder %s4304_s28, %s4300_s27  ;;  %p111_p1 = scmp.eq.s32.totalorder %s4390_s9, 0 }
   0xc   : > { %p4993_p2 = scmp.eq.s32.totalorder %s4390_s9, 2  ;;  %p208_p3 = scmp.eq.s32.totalorder %s3135_s10, 2 }
   0xd   : > { %p4399_p4 = por %p111_p1, %p110_p0  ;;  %p3136_p5 = scmp.ge.s32.totalorder %s4312_s30, 1 }
   0xe   : > { %p4404_p6 = por %p208_p3, %p110_p0  ;;  %p236_p7 = scmp.lt.s32.totalorder %s4312_s30, 4 }
   0xf   : > { %s4998_s5 = sld [smem:[#allocation19_spill]]  ;;  %s4314_s17 = smov [#allocation8]  }
  0x10   : > { %p4413_p9 = pnand %p3136_p5, %p236_p7  ;;  %s269_s18 = sshll.u32 %s4314_s17, 4  ;;  %s270_s18 = int_to_ptr.vmem [resolvable:$true] %s269_s18 }
  0x11   : > { %s5000_s0 = sld [smem:[#allocation18_spill]]  ;;  %s4991_s22 = smov 64  }
  0x12   : > { %p4042_p10 = pneg %p4413_p9  ;;  %s4992_s23 = smov 4  }
  0x13   : > { %s4317_s24 = smov [#allocation3]   ;;  %s4318_s26 = smov 256  }
  0x14   : > { %p4043_p11 = pnand %p4042_p10, %p111_p1  ;;  %s249_s25 = sshll.u32 %s4317_s24, 4  ;;  %s250_s25 = int_to_ptr.vmem [resolvable:$true] %s249_s25 }
  0x15   : > { %s267_s15 = sshll.u32 %s4998_s5, 4  ;;  %s4319_s10 = smov 16   ;;  %s268_s15 = int_to_ptr.hbm [resolvable:$true] %s267_s15 }
  0x16   : > { %4048 = dma.hbm_to_vmem [thread:$0]  (!%p4043_p11), %s268_s15, 4096, %s270_s18, [#allocation7], %s4991_s22, %s4991_s22, %s4992_s23  }
  0x17   : > { %s247_s21 = sshll.u32 %s5000_s0, 4  ;;  %s4428_s13 = sadd.s32 1, %s4312_s30   ;;  %s248_s21 = int_to_ptr.hbm [resolvable:$true] %s247_s21 }
  0x18   : > { %4045 = dma.hbm_to_vmem [thread:$0]  (!%p4043_p11), %s248_s21, 2048, %s250_s25, [#allocation4], %s4318_s26, %s4318_s26, %s4319_s10  }
  0x19   : > { %s94_s14 = ssub.s32 %s4312_s30, %s4428_s13  ;;  %s97_s17 = sadd.s32 1, %s4308_s29 }
  0x1a   : > { %p95_p12 = scmp.eq.s32.totalorder %s94_s14, 0  ;;  %p104_p13 = scmp.ne.s32.totalorder %s4308_s29, %s4304_s28 }
  0x1b   : > { %p105_p0 = scmp.eq.s32.totalorder %s4312_s30, 0  ;;  %p4059_p7 = scmp.lt.s32.totalorder %s4312_s30, 3 }
  0x1c   : > { %s4437_s19 = scalar_select %p95_p12, %s4308_s29, %s97_s17  }
  0x1d   : > { %p4441_p3 = por %p4993_p2, %p104_p13  ;;  %p106_p5 = por %p105_p0, %p104_p13 }
  0x1e   : > { %5001 = sst [smem:[#allocation17_spill]] %s4437_s19  ;;  %s286_s18 = sand.u32 1, %s4312_s30  }
  0x1f   : > { %s288_s20 = sand.u32 1, %s4308_s29   ;;  %s3704_s24 = sshll.u32 %s4312_s30, 7 }
  0x20   : > { %s3140_s21 = sshll.u32 %s288_s20, 7  ;;  %s295_s10 = scalar_lea.hbm %s4985_s3, %s3704_s24 }
  0x21   : > { %s296_s14 = sshll.u32 %s295_s10, 4  ;;  %s290_s22 = scalar_lea.vmem [#allocation6], %s3140_s21  ;;  %s297_s14 = int_to_ptr.hbm [resolvable:$true] %s296_s14 }
  0x22   : > { %s298_s23 = sshll.u32 %s290_s22, 4  ;;  %p4452_p10 = pnand %p4059_p7, %p106_p5  ;;  %s299_s23 = int_to_ptr.vmem [resolvable:$true] %s298_s23 }
  0x23   : > { %s287_s0 = scalar_lea.sflag [#allocation7], %s286_s18  ;;  %s4176_s5 = sshra.s32 %s297_s14, 4  ;;  %s4177_s5 = int_to_ptr.hbm [resolvable:$true] %s4176_s5 }
  0x24   : > { %s4178_s19 = scalar_lea.hbm %s4177_s5, 128  ;;  %p4180_p12 = pneg %p4452_p10 }
  0x25   : > { %p4179_p11 = scmp.ne.s32.totalorder %s4177_s5, %s4178_s19  ;;  %s4183_s22 = scalar_lea.hbm %s4985_s3, 384 }
  0x26   : > { %p4184_p5 = scmp.lt.s32.totalorder %s4177_s5, %s4985_s3  ;;  %p4185_p7 = scmp.lt.s32.totalorder %s4183_s22, %s4178_s19 }
  0x27   : > { %p4181_p13 = pnand %p4180_p12, %p4179_p11 }
  0x28   : > { %p4186_p2 = por %p4185_p7, %p4184_p5 }
  0x29   : > { %p4182_p0 = pneg %p4181_p13 }
  0x2b   : > { %p4187_p8 = pnand %p4186_p2, %p4182_p0 }
  0x2d   : > { %4190 = shalt.err (!%p4187_p8)
}
  0x2e   : > { %s5004_s18 = smov 4   ;;  %s5005_s26 = smov 64  }
  0x2f   : > { %4052 = dma.hbm_to_vmem [thread:$0]  (!%p4452_p10), %s297_s14, 2048, %s299_s23, %s287_s0, %s5005_s26, %s5005_s26, %s5004_s18  }
  0x30   : > { %316 = sbr.rel (%p4413_p9) target bundleno = 1102 (0x44e), region = 48 }
  0x35   : > { %4279 = dma.done.wait (%p111_p1), [#allocation4], 2048  }
  0x36   : > { %4281 = vsyncadd (%p111_p1), [#allocation4], 4294965248  ;;  %s323_s5 = sand.u32 1, %s4390_s9   ;;  %s4477_s19 = sand.u32 1, %s4304_s28  }
  0x37   : > { %s3145_s10 = sshll.u32 %s4477_s19, 7  ;;  %s324_s17 = scalar_lea.sflag [#allocation7], %s323_s5 }
  0x38   : > { %s4480_s20 = scalar_lea.vmem [#allocation6], %s3145_s10 }
  0x39   : > { %4283 = dma.done.wait (%p4399_p4), %s324_s17, 2048  }
  0x3a   : > { %4285 = vsyncadd (%p4399_p4), %s324_s17, 4294965248 }
  0x3b   : > { %4287 = dma.done.wait (%p111_p1), [#allocation7], 4096  }
  0x3c   : > { %4289 = vsyncadd (%p111_p1), [#allocation7], 4294963200  ;;  %s3147_s0 = sshll.u32 %s4477_s19, 8  ;;  %p369_p2 = scmp.lt.s32.totalorder %s4390_s9, 2 }
  0x3d   : > { %s4499_s11 = scalar_lea.vmem [#allocation9], %s3147_s0  ;;  %p5006_p4 = scmp.ne.s32.totalorder %s4390_s9, 0 }
  0x3e   : > { %s4493_s16 = scalar_select %p369_p2, %s4390_s9, 2 }
  0x3f   : > { %375 = sbr.rel (%p5006_p4) target bundleno = 87 (0x57), region = 64 }
  0x40   : > { %s371_s24 = scalar_lea.vmem %s4986_s4, %s4493_s16 }
  0x44   : > { %v376_v0 = vld [vmem:[%s4984_s2] sm:$0xff]  ;;  %v377_v1 = vld [vmem:[%s4984_s2 + $0x8] sm:$0xff]  ;;  %v378_v2 = vld [vmem:[%s4984_s2 + $0x10] sm:$0xff] }
  0x45   : > { %v3838_v3 = vpack.c.bf16 %v377_v1, %v376_v0  ;;  %v379_v4 = vld [vmem:[%s4984_s2 + $0x18] sm:$0xff]  ;;  %v380_v5 = vld [vmem:[%s4984_s2 + $0x20] sm:$0xff]  ;;  %v381_v6 = vld [vmem:[%s4984_s2 + $0x28] sm:$0xff] }
  0x46   : > { %v3843_v7 = vpack.c.bf16 %v379_v4, %v378_v2  ;;  %v3848_v8 = vpack.c.bf16 %v381_v6, %v380_v5  ;;  %v382_v9 = vld [vmem:[%s4984_s2 + $0x30] sm:$0xff]  ;;  %v383_v10 = vld [vmem:[%s4984_s2 + $0x38] sm:$0xff]  ;;  %v384_v11 = vld [vmem:[%s4984_s2 + $0x40] sm:$0xff] }
  0x47   : > { %3839 = vst [vmem:[#allocation2] sm:$0xff] %v3838_v3   ;;  %v3853_v12 = vpack.c.bf16 %v383_v10, %v382_v9  ;;  %v385_v13 = vld [vmem:[%s4984_s2 + $0x48] sm:$0xff]  ;;  %v386_v14 = vld [vmem:[%s4984_s2 + $0x50] sm:$0xff]  ;;  %v387_v15 = vld [vmem:[%s4984_s2 + $0x58] sm:$0xff] }
  0x48   : > { %3995 = vst [vmem:[#allocation2 + $0x8] sm:$0xff] %v3843_v7   ;;  %v3858_v16 = vpack.c.bf16 %v385_v13, %v384_v11  ;;  %v3863_v17 = vpack.c.bf16 %v387_v15, %v386_v14  ;;  %v388_v18 = vld [vmem:[%s4984_s2 + $0x60] sm:$0xff]  ;;  %v389_v19 = vld [vmem:[%s4984_s2 + $0x68] sm:$0xff]  ;;  %v390_v20 = vld [vmem:[%s4984_s2 + $0x70] sm:$0xff] }
  0x49   : > { %3996 = vst [vmem:[#allocation2 + $0x10] sm:$0xff] %v3848_v8   ;;  %v3868_v21 = vpack.c.bf16 %v389_v19, %v388_v18  ;;  %v391_v22 = vld [vmem:[%s4984_s2 + $0x78] sm:$0xff]  ;;  %v392_v23 = vld [vmem:[%s4984_s2 + $0x80] sm:$0xff]  ;;  %v393_v24 = vld [vmem:[%s4984_s2 + $0x88] sm:$0xff] }
  0x4a   : > { %3997 = vst [vmem:[#allocation2 + $0x18] sm:$0xff] %v3853_v12   ;;  %v3873_v25 = vpack.c.bf16 %v391_v22, %v390_v20  ;;  %v394_v26 = vld [vmem:[%s4984_s2 + $0x90] sm:$0xff]  ;;  %v395_v27 = vld [vmem:[%s4984_s2 + $0x98] sm:$0xff]  ;;  %v396_v28 = vld [vmem:[%s4984_s2 + $0xa0] sm:$0xff]  ;;  %v3878_v29 = vpack.c.bf16 %v393_v24, %v392_v23 }
  0x4b   : > { %3998 = vst [vmem:[#allocation2 + $0x20] sm:$0xff] %v3858_v16   ;;  %v397_v30 = vld [vmem:[%s4984_s2 + $0xa8] sm:$0xff]  ;;  %v398_v31 = vld [vmem:[%s4984_s2 + $0xb0] sm:$0xff]  ;;  %v399_v32 = vld [vmem:[%s4984_s2 + $0xb8] sm:$0xff]  ;;  %v3883_v33 = vpack.c.bf16 %v395_v27, %v394_v26 }
  0x4c   : > { %3999 = vst [vmem:[#allocation2 + $0x28] sm:$0xff] %v3863_v17   ;;  %v400_v34 = vld [vmem:[%s4984_s2 + $0xc0] sm:$0xff]  ;;  %v401_v35 = vld [vmem:[%s4984_s2 + $0xc8] sm:$0xff]  ;;  %v3888_v36 = vpack.c.bf16 %v397_v30, %v396_v28  ;;  %v402_v37 = vld [vmem:[%s4984_s2 + $0xd0] sm:$0xff]  ;;  %v3893_v39 = vpack.c.bf16 %v399_v32, %v398_v31 }
  0x4d   : > { %4000 = vst [vmem:[#allocation2 + $0x30] sm:$0xff] %v3868_v21   ;;  %v403_v38 = vld [vmem:[%s4984_s2 + $0xd8] sm:$0xff]  ;;  %v404_v40 = vld [vmem:[%s4984_s2 + $0xe0] sm:$0xff]  ;;  %v405_v41 = vld [vmem:[%s4984_s2 + $0xe8] sm:$0xff]  ;;  %v3898_v42 = vpack.c.bf16 %v401_v35, %v400_v34 }
  0x4e   : > { %4001 = vst [vmem:[#allocation2 + $0x38] sm:$0xff] %v3873_v25   ;;  %v406_v43 = vld [vmem:[%s4984_s2 + $0xf0] sm:$0xff]  ;;  %v407_v44 = vld [vmem:[%s4984_s2 + $0xf8] sm:$0xff]  ;;  %v3903_v45 = vpack.c.bf16 %v403_v38, %v402_v37  ;;  %v3908_v46 = vpack.c.bf16 %v405_v41, %v404_v40 }
  0x4f   : > { %4002 = vst [vmem:[#allocation2 + $0x40] sm:$0xff] %v3878_v29   ;;  %v3913_v47 = vpack.c.bf16 %v407_v44, %v406_v43 }
  0x50   : > { %4003 = vst [vmem:[#allocation2 + $0x48] sm:$0xff] %v3883_v33  }
  0x51   : > { %4004 = vst [vmem:[#allocation2 + $0x50] sm:$0xff] %v3888_v36  }
  0x52   : > { %4005 = vst [vmem:[#allocation2 + $0x58] sm:$0xff] %v3893_v39  }
  0x53   : > { %4006 = vst [vmem:[#allocation2 + $0x60] sm:$0xff] %v3898_v42  }
  0x54   : > { %4007 = vst [vmem:[#allocation2 + $0x68] sm:$0xff] %v3903_v45  }
  0x55   : > { %4008 = vst [vmem:[#allocation2 + $0x70] sm:$0xff] %v3908_v46  }
  0x56   : > { %4009 = vst [vmem:[#allocation2 + $0x78] sm:$0xff] %v3913_v47  }
  0x57 PF: > { %v959_v48 = vld [vmem:[%s4983_s1 + $0x10] sm:$0xff]  ;;  %v957_v49 = vld [vmem:[%s4983_s1] sm:$0xff]  ;;  %s3705_s25 = sshll.u32 %s4390_s9, 7  ;;  %v4320_v50 = vmov 0   ;;  %v960_v55 = vld [vmem:[%s4983_s1 + $0x18] sm:$0xff]  ;;  %p3312_p1 = scmp.ne.s32.totalorder %s4390_s9, 2 }
  0x58   : > { %4108 = vset.pattern.permute.xlu1 %v4320_v50  ;;  %4107 = vset.pattern.permute.xlu0 %v4320_v50  ;;  %s4606_s18 = scalar_lea.vmem [#allocation2], %s3705_s25  ;;  %v958_v56 = vld [vmem:[%s4983_s1 + $0x8] sm:$0xff]  ;;  %v961_v57 = vld [vmem:[%s4983_s1 + $0x20] sm:$0xff]  ;;  %v964_v63 = vld [vmem:[%s4983_s1 + $0x38] sm:$0xff] }
  0x59   : > { %1001 = vperm.xlu1 %4108, %v959_v48   ;;  %991 = vperm.xlu0 %4107, %v957_v49   ;;  %v962_v62 = vld [vmem:[%s4983_s1 + $0x28] sm:$0xff]  ;;  %v963_v0 = vld [vmem:[%s4983_s1 + $0x30] sm:$0xff]  ;;  %v507_v5 = vld [vmem:[#allocation3] sm:$0xff] }
  0x5a   : > { %4109 = vset.pattern.permute.xlu2 %v4320_v50  ;;  %v508_v6 = vld [vmem:[#allocation3 + $0x8] sm:$0xff]  ;;  %v965_v7 = vld [vmem:[%s4983_s1 + $0x40] sm:$0xff]  ;;  %v967_v8 = vld [vmem:[%s4983_s1 + $0x50] sm:$0xff]  ;;  %v523_v10 = vunpack.c.0.s8 %v507_v5  ;;  %v525_v11 = vunpack.c.1.s8 %v507_v5  ;;  %v527_v30 = vunpack.c.2.s8 %v507_v5  ;;  %v529_v31 = vunpack.c.3.s8 %v507_v5 }
  0x5b   : > { %1011 = vperm.xlu2 %4109, %v961_v57   ;;  %v966_v9 = vld [vmem:[%s4983_s1 + $0x48] sm:$0xff]  ;;  %v524_v12 = vunpack.c.0.s8 %v508_v6  ;;  %v526_v13 = vunpack.c.1.s8 %v508_v6  ;;  %v968_v22 = vld [vmem:[%s4983_s1 + $0x58] sm:$0xff]  ;;  %v969_v24 = vld [vmem:[%s4983_s1 + $0x60] sm:$0xff]  ;;  %v528_v32 = vunpack.c.2.s8 %v508_v6  ;;  %v530_v33 = vunpack.c.3.s8 %v508_v6 }
  0x5c   : > { %v587_v16 = vcvt.s32.f32 %v523_v10  ;;  %v589_v17 = vcvt.s32.f32 %v525_v11  ;;  %v970_v23 = vld [vmem:[%s4983_s1 + $0x68] sm:$0xff]  ;;  %v971_v27 = vld [vmem:[%s4983_s1 + $0x70] sm:$0xff]  ;;  %v973_v28 = vld [vmem:[%s4983_s1 + $0x80] sm:$0xff]  ;;  %v591_v34 = vcvt.s32.f32 %v527_v30  ;;  %v593_v35 = vcvt.s32.f32 %v529_v31 }
  0x5d   : > { %v4609_v51 = vld [vmem:[%s4606_s18 + $0x38] sm:$0xff]  ;;  %v4614_v53 = vld [vmem:[%s4606_s18 + $0x30] sm:$0xff]  ;;  %v4628_v58 = vld [vmem:[%s4606_s18 + $0x28] sm:$0xff]  ;;  %v588_v18 = vcvt.s32.f32 %v524_v12  ;;  %v590_v19 = vcvt.s32.f32 %v526_v13  ;;  %v592_v36 = vcvt.s32.f32 %v528_v32  ;;  %v594_v37 = vcvt.s32.f32 %v530_v33 }
  0x5e   : > { %v3721_v52 = vld [vmem:[%s4606_s18 + $0x78] sm:$0xff]  ;;  %779 = vmatpush.bf16.msra.mxu0 %v4609_v51  ;;  %v3720_v54 = vld [vmem:[%s4606_s18 + $0x70] sm:$0xff]  ;;  %v3719_v59 = vld [vmem:[%s4606_s18 + $0x68] sm:$0xff]  ;;  %v651_v25 = vpack.c.bf16 %v589_v17, %v587_v16  ;;  %v653_v41 = vpack.c.bf16 %v593_v35, %v591_v34 }
  0x5f   : > { %868 = vmatpush.bf16.msra.mxu1 %v3721_v52  ;;  %v4633_v60 = vld [vmem:[%s4606_s18 + $0x20] sm:$0xff]  ;;  %v4647_v1 = vld [vmem:[%s4606_s18 + $0x18] sm:$0xff]  ;;  %v4653_v3 = vld [vmem:[%s4606_s18 + $0x10] sm:$0xff]  ;;  %v652_v26 = vpack.c.bf16 %v590_v19, %v588_v18  ;;  %v654_v42 = vpack.c.bf16 %v594_v37, %v592_v36 }
  0x60   : > { %v3718_v61 = vld [vmem:[%s4606_s18 + $0x60] sm:$0xff]  ;;  %v4650_v2 = vld [vmem:[%s4606_s18 + $0x58] sm:$0xff]  ;;  %v4658_v4 = vld [vmem:[%s4606_s18 + $0x50] sm:$0xff] }
  0x61   : > { %1006 = vperm.xlu1 %4108, %v960_v55   ;;  %996 = vperm.xlu0 %4107, %v958_v56   ;;  %v4672_v14 = vld [vmem:[%s4606_s18 + $0x8] sm:$0xff]  ;;  %v4680_v20 = vld [vmem:[%s4606_s18] sm:$0xff]  ;;  %v972_v29 = vld [vmem:[%s4983_s1 + $0x78] sm:$0xff] }
  0x62   : > { %780 = vmatpush.bf16.msra.mxu0 %v4614_v53  ;;  %v4675_v15 = vld [vmem:[%s4606_s18 + $0x48] sm:$0xff]  ;;  %v4683_v21 = vld [vmem:[%s4606_s18 + $0x40] sm:$0xff]  ;;  %v976_v39 = vld [vmem:[%s4983_s1 + $0x98] sm:$0xff] }
  0x63   : > { %869 = vmatpush.bf16.msra.mxu1 %v3720_v54  ;;  %1016 = vperm.xlu2 %4109, %v962_v62   ;;  %v974_v38 = vld [vmem:[%s4983_s1 + $0x88] sm:$0xff]  ;;  %v975_v40 = vld [vmem:[%s4983_s1 + $0x90] sm:$0xff]  ;;  %v510_v44 = vld [vmem:[#allocation3 + $0x18] sm:$0xff] }
  0x64   : > { %v509_v43 = vld [vmem:[#allocation3 + $0x10] sm:$0xff]  ;;  %v977_v45 = vld [vmem:[%s4983_s1 + $0xa0] sm:$0xff]  ;;  %v978_v47 = vld [vmem:[%s4983_s1 + $0xa8] sm:$0xff]  ;;  %v532_v50 = vunpack.c.0.s8 %v510_v44  ;;  %v534_v52 = vunpack.c.1.s8 %v510_v44  ;;  %v536_v10 = vunpack.c.2.s8 %v510_v44  ;;  %v538_v11 = vunpack.c.3.s8 %v510_v44 }
  0x65   : > { %v979_v46 = vld [vmem:[%s4983_s1 + $0xb0] sm:$0xff]  ;;  %v531_v48 = vunpack.c.0.s8 %v509_v43  ;;  %v533_v49 = vunpack.c.1.s8 %v509_v43  ;;  %v981_v62 = vld [vmem:[%s4983_s1 + $0xc0] sm:$0xff]  ;;  %v986_v18 = vld [vmem:[%s4983_s1 + $0xe8] sm:$0xff] }
  0x66   : > { %781 = vmatpush.bf16.msra.mxu0 %v4628_v58  ;;  %v596_v56 = vcvt.s32.f32 %v532_v50  ;;  %v598_v57 = vcvt.s32.f32 %v534_v52  ;;  %v983_v5 = vld [vmem:[%s4983_s1 + $0xd0] sm:$0xff]  ;;  %v985_v6 = vld [vmem:[%s4983_s1 + $0xe0] sm:$0xff]  ;;  %v600_v16 = vcvt.s32.f32 %v536_v10  ;;  %v602_v17 = vcvt.s32.f32 %v538_v11  ;;  %v988_v19 = vld [vmem:[%s4983_s1 + $0xf8] sm:$0xff] }
  0x67   : > { %870 = vmatpush.bf16.msra.mxu1 %v3719_v59  ;;  %v595_v54 = vcvt.s32.f32 %v531_v48  ;;  %v597_v55 = vcvt.s32.f32 %v533_v49  ;;  %v980_v59 = vld [vmem:[%s4983_s1 + $0xb8] sm:$0xff]  ;;  %v513_v50 = vld [vmem:[#allocation3 + $0x30] sm:$0xff] }
  0x68   : > { %v3729_v49 = vld [vmem:[%s4480_s20 + $0x38] sm:$0xff] }
  0x69   : > { %1026 = vperm.xlu1 %4108, %v964_v63   ;;  %1021 = vperm.xlu0 %4107, %v963_v0   ;;  %v655_v63 = vpack.c.bf16 %v597_v55, %v595_v54  ;;  %v656_v0 = vpack.c.bf16 %v598_v57, %v596_v56  ;;  %v514_v52 = vld [vmem:[#allocation3 + $0x38] sm:$0xff]  ;;  %v3735_v54 = vld [vmem:[%s4480_s20 + $0x68] sm:$0xff]  ;;  %v3728_v55 = vld [vmem:[%s4480_s20 + $0x30] sm:$0xff]  ;;  %v547_v57 = vunpack.c.0.s8 %v513_v50 }
  0x6a   : > { %782 = vmatpush.bf16.msra.mxu0 %v4633_v60  ;;  %1441 = vmatpush.bf16.msra.mxu2 %v3729_v49  ;;  %v3734_v56 = vld [vmem:[%s4480_s20 + $0x60] sm:$0xff] }
  0x6b   : > { %871 = vmatpush.bf16.msra.mxu1 %v3718_v61  ;;  %1031 = vperm.xlu2 %4109, %v965_v7   ;;  %v982_v61 = vld [vmem:[%s4983_s1 + $0xc8] sm:$0xff]  ;;  %v984_v7 = vld [vmem:[%s4983_s1 + $0xd8] sm:$0xff] }
  0x6e   : > { %783 = vmatpush.bf16.msra.mxu0 %v4647_v1  ;;  %1442 = vmatpush.bf16.msra.mxu2 %v3728_v55 }
  0x6f   : > { %872 = vmatpush.bf16.msra.mxu1 %v4650_v2 }
  0x71   : > { %1041 = vperm.xlu1 %4108, %v967_v8   ;;  %1036 = vperm.xlu0 %4107, %v966_v9   ;;  %v535_v8 = vunpack.c.2.s8 %v509_v43  ;;  %v537_v9 = vunpack.c.3.s8 %v509_v43 }
  0x72   : > { %784 = vmatpush.bf16.msra.mxu0 %v4653_v3 }
  0x73   : > { %873 = vmatpush.bf16.msra.mxu1 %v4658_v4  ;;  %1046 = vperm.xlu2 %4109, %v968_v22   ;;  %v599_v12 = vcvt.s32.f32 %v535_v8  ;;  %v601_v13 = vcvt.s32.f32 %v537_v9  ;;  %v987_v22 = vld [vmem:[%s4983_s1 + $0xf0] sm:$0xff]  ;;  %v3733_v8 = vld [vmem:[%s4480_s20 + $0x58] sm:$0xff]  ;;  %v3726_v9 = vld [vmem:[%s4480_s20 + $0x20] sm:$0xff] }
  0x76   : > { %785 = vmatpush.bf16.msra.mxu0 %v4672_v14 }
  0x77   : > { %874 = vmatpush.bf16.msra.mxu1 %v4675_v15 }
  0x79   : > { %1056 = vperm.xlu1 %4108, %v970_v23   ;;  %1051 = vperm.xlu0 %4107, %v969_v24   ;;  %v657_v23 = vpack.c.bf16 %v601_v13, %v599_v12  ;;  %v658_v24 = vpack.c.bf16 %v602_v17, %v600_v16  ;;  %v3732_v12 = vld [vmem:[%s4480_s20 + $0x50] sm:$0xff]  ;;  %v3725_v13 = vld [vmem:[%s4480_s20 + $0x18] sm:$0xff]  ;;  %v3731_v16 = vld [vmem:[%s4480_s20 + $0x48] sm:$0xff] }
  0x7a   : > { %786 = vmatpush.bf16.msra.mxu0 %v4680_v20  ;;  %v3724_v17 = vld [vmem:[%s4480_s20 + $0x10] sm:$0xff] }
  0x7b   : > { %875 = vmatpush.bf16.msra.mxu1 %v4683_v21  ;;  %1061 = vperm.xlu2 %4109, %v971_v27  }
  0x7d   : > { %787 = vmatmul.bf16.vlgmr.msra.gmra.mxu0 %v651_v25  ;;  %v511_v25 = vld [vmem:[#allocation3 + $0x20] sm:$0xff] }
  0x7e   : > { %876 = vmatmul.bf16.vlgmr.msra.gmra.mxu1 %v652_v26  ;;  %v512_v26 = vld [vmem:[#allocation3 + $0x28] sm:$0xff]  ;;  %v539_v27 = vunpack.c.0.s8 %v511_v25  ;;  %v543_v37 = vunpack.c.2.s8 %v511_v25 }
  0x7f   : > { %v542_v30 = vunpack.c.1.s8 %v512_v26 }
  0x80   : > { %v603_v31 = vcvt.s32.f32 %v539_v27 }
  0x81   : > { %1071 = vperm.xlu1 %4108, %v973_v28   ;;  %1066 = vperm.xlu0 %4107, %v972_v29   ;;  %v541_v28 = vunpack.c.1.s8 %v511_v25  ;;  %v540_v29 = vunpack.c.0.s8 %v512_v26  ;;  %v606_v34 = vcvt.s32.f32 %v542_v30  ;;  %v3722_v30 = vld [vmem:[%s4480_s20] sm:$0xff] }
  0x83   : > { %1076 = vperm.xlu2 %4109, %v974_v38   ;;  %v605_v32 = vcvt.s32.f32 %v541_v28  ;;  %v604_v33 = vcvt.s32.f32 %v540_v29  ;;  %v545_v38 = vunpack.c.3.s8 %v511_v25  ;;  %v3723_v25 = vld [vmem:[%s4480_s20 + $0x8] sm:$0xff] }
  0x85   : > { %v659_v35 = vpack.c.bf16 %v605_v32, %v603_v31  ;;  %v660_v36 = vpack.c.bf16 %v606_v34, %v604_v33  ;;  %v515_v33 = vld [vmem:[#allocation3 + $0x40] sm:$0xff]  ;;  %v516_v34 = vld [vmem:[#allocation3 + $0x48] sm:$0xff] }
  0x86   : > { %v561_v49 = vunpack.c.3.s8 %v515_v33 }
  0x89   : > { %1086 = vperm.xlu1 %4108, %v976_v39   ;;  %1081 = vperm.xlu0 %4107, %v975_v40   ;;  %v544_v39 = vunpack.c.2.s8 %v512_v26  ;;  %v546_v40 = vunpack.c.3.s8 %v512_v26 }
  0x8b   : > { %1091 = vperm.xlu2 %4109, %v977_v45   ;;  %v608_v43 = vcvt.s32.f32 %v544_v39  ;;  %v610_v44 = vcvt.s32.f32 %v546_v40  ;;  %v3737_v45 = vld [vmem:[%s4480_s20 + $0x78] sm:$0xff] }
  0x8c   : > { %1530 = vmatpush.bf16.msra.mxu3 %v3737_v45 }
  0x8d   : > { %792 = vmatmul.bf16.gmra.mxu0 %v653_v41  ;;  %v607_v41 = vcvt.s32.f32 %v543_v37  ;;  %v662_v48 = vpack.c.bf16 %v610_v44, %v608_v43  ;;  %v556_v37 = vunpack.c.0.s8 %v516_v34 }
  0x8e   : > { %881 = vmatmul.bf16.gmra.mxu1 %v654_v42  ;;  %v609_v42 = vcvt.s32.f32 %v545_v38  ;;  %v558_v38 = vunpack.c.1.s8 %v516_v34 }
  0x91   : > { %1101 = vperm.xlu1 %4108, %v979_v46   ;;  %1096 = vperm.xlu0 %4107, %v978_v47   ;;  %v3736_v46 = vld [vmem:[%s4480_s20 + $0x70] sm:$0xff]  ;;  %v661_v47 = vpack.c.bf16 %v609_v42, %v607_v41  ;;  %v620_v41 = vcvt.s32.f32 %v556_v37  ;;  %v622_v42 = vcvt.s32.f32 %v558_v38 }
  0x92   : > { %1531 = vmatpush.bf16.msra.mxu3 %v3736_v46 }
  0x93   : > { %1106 = vperm.xlu2 %4109, %v980_v59   ;;  %v549_v59 = vunpack.c.1.s8 %v513_v50  ;;  %v668_v44 = vpack.c.bf16 %v622_v42, %v620_v41 }
  0x96   : > { %1532 = vmatpush.bf16.msra.mxu3 %v3735_v54  ;;  %v562_v54 = vunpack.c.3.s8 %v516_v34 }
  0x99   : > { %1116 = vperm.xlu1 %4108, %v982_v61   ;;  %1111 = vperm.xlu0 %4107, %v981_v62   ;;  %v548_v61 = vunpack.c.0.s8 %v514_v52  ;;  %v550_v62 = vunpack.c.1.s8 %v514_v52 }
  0x9a   : > { %1533 = vmatpush.bf16.msra.mxu3 %v3734_v56 }
  0x9b   : > { %1121 = vperm.xlu2 %4109, %v983_v5   ;;  %v613_v5 = vcvt.s32.f32 %v549_v59 }
  0x9d   : > { %797 = vmatmul.bf16.gmra.mxu0 %v655_v63  ;;  %v3727_v63 = vld [vmem:[%s4480_s20 + $0x28] sm:$0xff] }
  0x9e   : > { %886 = vmatmul.bf16.gmra.mxu1 %v656_v0  ;;  %v611_v0 = vcvt.s32.f32 %v547_v57  ;;  %1443 = vmatpush.bf16.msra.mxu2 %v3727_v63 }
  0x9f   : > { %1534 = vmatpush.bf16.msra.mxu3 %v3733_v8 }
  0xa0   : > { %v663_v10 = vpack.c.bf16 %v613_v5, %v611_v0  ;;  %v626_v5 = vcvt.s32.f32 %v562_v54 }
  0xa1   : > { %1131 = vperm.xlu1 %4108, %v985_v6   ;;  %1126 = vperm.xlu0 %4107, %v984_v7   ;;  %v612_v6 = vcvt.s32.f32 %v548_v61  ;;  %v614_v7 = vcvt.s32.f32 %v550_v62  ;;  %v625_v62 = vcvt.s32.f32 %v561_v49 }
  0xa2   : > { %1444 = vmatpush.bf16.msra.mxu2 %v3726_v9 }
  0xa3   : > { %1136 = vperm.xlu2 %4109, %v986_v18   ;;  %v664_v11 = vpack.c.bf16 %v614_v7, %v612_v6  ;;  %1535 = vmatpush.bf16.msra.mxu3 %v3732_v12  ;;  %v551_v18 = vunpack.c.2.s8 %v513_v50 }
  0xa5   : > { %v615_v26 = vcvt.s32.f32 %v551_v18  ;;  %v517_v18 = vld [vmem:[#allocation3 + $0x50] sm:$0xff] }
  0xa6   : > { %1445 = vmatpush.bf16.msra.mxu2 %v3725_v13 }
  0xa7   : > { %1536 = vmatpush.bf16.msra.mxu3 %v3731_v16 }
  0xa9   : > { %1146 = vperm.xlu1 %4108, %v988_v19   ;;  %1141 = vperm.xlu0 %4107, %v987_v22   ;;  %v553_v19 = vunpack.c.3.s8 %v513_v50  ;;  %v552_v22 = vunpack.c.2.s8 %v514_v52 }
  0xaa   : > { %1446 = vmatpush.bf16.msra.mxu2 %v3724_v17 }
  0xab   : > { %v617_v27 = vcvt.s32.f32 %v553_v19  ;;  %v616_v28 = vcvt.s32.f32 %v552_v22  ;;  %v518_v19 = vld [vmem:[#allocation3 + $0x58] sm:$0xff]  ;;  %v563_v22 = vunpack.c.0.s8 %v517_v18 }
  0xac   : > { %v570_v49 = vunpack.c.3.s8 %v518_v19 }
  0xad   : > { %802 = vmatmul.bf16.gmra.mxu0 %v657_v23  ;;  %v554_v23 = vunpack.c.3.s8 %v514_v52  ;;  %v665_v31 = vpack.c.bf16 %v617_v27, %v615_v26  ;;  %v560_v52 = vunpack.c.2.s8 %v516_v34  ;;  %v566_v26 = vunpack.c.1.s8 %v518_v19 }
  0xae   : > { %891 = vmatmul.bf16.gmra.mxu1 %v658_v24  ;;  %v3730_v24 = vld [vmem:[%s4480_s20 + $0x40] sm:$0xff]  ;;  %1447 = vmatpush.bf16.msra.mxu2 %v3723_v25  ;;  %v564_v25 = vunpack.c.0.s8 %v518_v19 }
  0xaf   : > { %1537 = vmatpush.bf16.msra.mxu3 %v3730_v24  ;;  %v618_v29 = vcvt.s32.f32 %v554_v23  ;;  %v624_v0 = vcvt.s32.f32 %v560_v52  ;;  %v565_v23 = vunpack.c.1.s8 %v517_v18 }
  0xb0   : > { %v628_v34 = vcvt.s32.f32 %v564_v25 }
  0xb1   : > { %v666_v32 = vpack.c.bf16 %v618_v29, %v616_v28  ;;  %v670_v9 = vpack.c.bf16 %v626_v5, %v624_v0 }
  0xb2   : > { %1538 = vmatmul.bf16.vlgmr.msra.gmra.mxu3 %v4680_v20  ;;  %1448 = vmatpush.bf16.msra.mxu2 %v3722_v30  ;;  %v627_v30 = vcvt.s32.f32 %v563_v22 }
  0xb5   : > { %v1012_v37 = vpop.permute.xlu2 %1011 }
  0xbd   : > { %807 = vmatmul.bf16.gmra.mxu0 %v659_v35  ;;  %v555_v35 = vunpack.c.0.s8 %v515_v33  ;;  %v1017_v54 = vpop.permute.xlu2 %1016 }
  0xbe   : > { %896 = vmatmul.bf16.gmra.mxu1 %v660_v36  ;;  %v557_v36 = vunpack.c.1.s8 %v515_v33 }
  0xbf   : > { %v619_v39 = vcvt.s32.f32 %v555_v35  ;;  %v630_v35 = vcvt.s32.f32 %v566_v26 }
  0xc0   : > { %v621_v40 = vcvt.s32.f32 %v557_v36 }
  0xc2   : > { %1543 = vmatmul.bf16.gmra.mxu3 %v4672_v14  ;;  %v667_v20 = vpack.c.bf16 %v621_v40, %v619_v39  ;;  %v672_v39 = vpack.c.bf16 %v630_v35, %v628_v34 }
  0xcb   : > { %v992_v43 = vpop.permute.xlu0 %991  ;;  %v1002_v7 = vpop.permute.xlu1 %1001 }
  0xcd   : > { %812 = vmatmul.bf16.gmra.mxu0 %v661_v47 }
  0xce   : > { %901 = vmatmul.bf16.gmra.mxu1 %v662_v48  ;;  %v559_v48 = vunpack.c.2.s8 %v515_v33 }
  0xd0   : > { %v623_v61 = vcvt.s32.f32 %v559_v48  ;;  %v568_v48 = vunpack.c.2.s8 %v518_v19 }
  0xd2   : > { %1548 = vmatmul.bf16.gmra.mxu3 %v4653_v3  ;;  %v669_v8 = vpack.c.bf16 %v625_v62, %v623_v61  ;;  %v632_v61 = vcvt.s32.f32 %v568_v48  ;;  %v634_v62 = vcvt.s32.f32 %v570_v49 }
  0xd3   : > { %v997_v59 = vpop.permute.xlu0 %996  ;;  %v1007_v29 = vpop.permute.xlu1 %1006 }
  0xd4   : > { %v674_v0 = vpack.c.bf16 %v634_v62, %v632_v61 }
  0xdb   : > { %v1027_v25 = vpop.permute.xlu1 %1026 }
  0xdd   : > { %817 = vmatmul.bf16.gmra.mxu0 %v663_v10 }
  0xde   : > { %906 = vmatmul.bf16.gmra.mxu1 %v664_v11 }
  0xe2   : > { %1553 = vmatmul.bf16.gmra.mxu3 %v4647_v1 }
  0xed   : > { %822 = vmatmul.bf16.gmra.mxu0 %v665_v31  ;;  %v629_v31 = vcvt.s32.f32 %v565_v23 }
  0xee   : > { %911 = vmatmul.bf16.gmra.mxu1 %v666_v32 }
  0xef   : > { %v671_v38 = vpack.c.bf16 %v629_v31, %v627_v30 }
  0xf2   : > { %1558 = vmatmul.bf16.gmra.mxu3 %v4633_v60 }
  0xfa   : > { %v788_v45 = vpop.f32.mrf.mxu0 }
  0xfb   : > { %v877_v46 = vpop.f32.mrf.mxu1 }
  0xfc   : > { %v878_v47 = vadd.f32 %v877_v46, %v788_v45  ;;  %v567_v45 = vunpack.c.2.s8 %v517_v18  ;;  %v569_v46 = vunpack.c.3.s8 %v517_v18 }
  0xfd   : > { %827 = vmatmul.bf16.gmra.mxu0 %v667_v20 }
  0xfe   : > { %916 = vmatmul.bf16.gmra.mxu1 %v668_v44  ;;  %v1149_v50 = vmul.f32 %v992_v43, %v878_v47 }
 0x100   : > { %v1181_v14 = vpack.c.bf16 %v1149_v50, %v1149_v50 }
 0x102   : > { %v790_v55 = vpop.f32.mrf.mxu0  ;;  %v1245_v10 = vunpack.c.l.b16 %v1181_v14  ;;  %1563 = vmatmul.bf16.gmra.mxu3 %v4628_v58 }
 0x103   : > { %v879_v56 = vpop.f32.mrf.mxu1 }
 0x104   : > { %v880_v57 = vadd.f32 %v879_v56, %v790_v55  ;;  %v631_v55 = vcvt.s32.f32 %v567_v45  ;;  %v633_v56 = vcvt.s32.f32 %v569_v46 }
 0x106   : > { %v1150_v63 = vmul.f32 %v997_v59, %v880_v57 }
 0x108   : > { %v1182_v6 = vpack.c.bf16 %v1150_v63, %v1150_v63  ;;  %v673_v63 = vpack.c.bf16 %v633_v56, %v631_v55 }
 0x10a   : > { %v1246_v11 = vunpack.c.l.b16 %v1182_v6  ;;  %v793_v12 = vpop.f32.mrf.mxu0 }
 0x10b   : > { %v882_v13 = vpop.f32.mrf.mxu1 }
 0x10c   : > { %v1277_v16 = vpack.c.b16 %v1246_v11, %v1245_v10  ;;  %v883_v17 = vadd.f32 %v882_v13, %v793_v12  ;;  %v519_v11 = vld [vmem:[#allocation3 + $0x60] sm:$0xff]  ;;  %v520_v12 = vld [vmem:[#allocation3 + $0x68] sm:$0xff]  ;;  %v1022_v13 = vpop.permute.xlu0 %1021 }
 0x10d   : > { %832 = vmatmul.bf16.gmra.mxu0 %v669_v8  ;;  %v572_v19 = vunpack.c.0.s8 %v520_v12  ;;  %v574_v22 = vunpack.c.1.s8 %v520_v12 }
 0x10e   : > { %921 = vmatmul.bf16.gmra.mxu1 %v670_v9  ;;  %1449 = vmatmul.bf16.vlgmr.msra.gmra.mxu2 %v1277_v16  ;;  %v1151_v24 = vmul.f32 %v1002_v7, %v883_v17  ;;  %v571_v16 = vunpack.c.0.s8 %v519_v11  ;;  %v573_v17 = vunpack.c.1.s8 %v519_v11 }
 0x10f   : > { %v638_v30 = vcvt.s32.f32 %v574_v22 }
 0x110   : > { %v1183_v32 = vpack.c.bf16 %v1151_v24, %v1151_v24  ;;  %v635_v26 = vcvt.s32.f32 %v571_v16 }
 0x112   : > { %v795_v3 = vpop.f32.mrf.mxu0  ;;  %v1247_v40 = vunpack.c.l.b16 %v1183_v32  ;;  %1568 = vmatmul.bf16.gmra.mxu3 %v4614_v53 }
 0x113   : > { %v884_v27 = vpop.f32.mrf.mxu1 }
 0x114   : > { %v885_v28 = vadd.f32 %v884_v27, %v795_v3  ;;  %v637_v3 = vcvt.s32.f32 %v573_v17 }
 0x116   : > { %v1152_v33 = vmul.f32 %v1007_v29, %v885_v28  ;;  %v636_v29 = vcvt.s32.f32 %v572_v19  ;;  %v675_v32 = vpack.c.bf16 %v637_v3, %v635_v26 }
 0x118   : > { %v1184_v36 = vpack.c.bf16 %v1152_v33, %v1152_v33  ;;  %v676_v33 = vpack.c.bf16 %v638_v30, %v636_v29 }
 0x11a   : > { %v1248_v41 = vunpack.c.l.b16 %v1184_v36  ;;  %v798_v42 = vpop.f32.mrf.mxu0 }
 0x11b   : > { %v887_v43 = vpop.f32.mrf.mxu1 }
 0x11c   : > { %v1278_v20 = vpack.c.b16 %v1248_v41, %v1247_v40  ;;  %v888_v44 = vadd.f32 %v887_v43, %v798_v42  ;;  %v1032_v40 = vpop.permute.xlu2 %1031  ;;  %v575_v41 = vunpack.c.2.s8 %v519_v11  ;;  %v577_v42 = vunpack.c.3.s8 %v519_v11 }
 0x11d   : > { %837 = vmatmul.bf16.gmra.mxu0 %v671_v38 }
 0x11e   : > { %926 = vmatmul.bf16.gmra.mxu1 %v672_v39  ;;  %1454 = vmatmul.bf16.gmra.mxu2 %v1278_v20  ;;  %v1153_v47 = vmul.f32 %v1012_v37, %v888_v44  ;;  %v576_v20 = vunpack.c.2.s8 %v520_v12  ;;  %v578_v44 = vunpack.c.3.s8 %v520_v12  ;;  %v639_v48 = vcvt.s32.f32 %v575_v41 }
 0x11f   : > { %v641_v49 = vcvt.s32.f32 %v577_v42 }
 0x120   : > { %v1185_v57 = vpack.c.bf16 %v1153_v47, %v1153_v47  ;;  %v1037_v47 = vpop.permute.xlu0 %1036 }
 0x121   : > { %v677_v56 = vpack.c.bf16 %v641_v49, %v639_v48 }
 0x122   : > { %v800_v50 = vpop.f32.mrf.mxu0  ;;  %v1249_v5 = vunpack.c.l.b16 %v1185_v57  ;;  %1573 = vmatmul.bf16.gmra.mxu3 %v4609_v51 }
 0x123   : > { %v889_v52 = vpop.f32.mrf.mxu1 }
 0x124   : > { %v890_v1 = vadd.f32 %v889_v52, %v800_v50  ;;  %v1047_v17 = vpop.permute.xlu2 %1046 }
 0x126   : > { %v1154_v59 = vmul.f32 %v1017_v54, %v890_v1  ;;  %v640_v1 = vcvt.s32.f32 %v576_v20  ;;  %v642_v54 = vcvt.s32.f32 %v578_v44 }
 0x128   : > { %v1186_v14 = vpack.c.bf16 %v1154_v59, %v1154_v59  ;;  %v678_v57 = vpack.c.bf16 %v642_v54, %v640_v1 }
 0x12a   : > { %v1250_v6 = vunpack.c.l.b16 %v1186_v14  ;;  %v803_v7 = vpop.f32.mrf.mxu0 }
 0x12b   : > { %v892_v8 = vpop.f32.mrf.mxu1 }
 0x12c   : > { %v1279_v9 = vpack.c.b16 %v1250_v6, %v1249_v5  ;;  %v893_v10 = vadd.f32 %v892_v8, %v803_v7  ;;  %v521_v5 = vld [vmem:[#allocation3 + $0x70] sm:$0xff]  ;;  %v522_v6 = vld [vmem:[#allocation3 + $0x78] sm:$0xff]  ;;  %v1042_v7 = vpop.permute.xlu1 %1041 }
 0x12d   : > { %842 = vmatmul.bf16.gmra.mxu0 %v673_v63  ;;  %v579_v8 = vunpack.c.0.s8 %v521_v5  ;;  %v580_v11 = vunpack.c.0.s8 %v522_v6  ;;  %v582_v12 = vunpack.c.1.s8 %v522_v6 }
 0x12e   : > { %931 = vmatmul.bf16.gmra.mxu1 %v674_v0  ;;  %1459 = vmatmul.bf16.gmra.mxu2 %v1279_v9  ;;  %v1155_v18 = vmul.f32 %v1022_v13, %v893_v10  ;;  %v581_v9 = vunpack.c.1.s8 %v521_v5 }
 0x130   : > { %v1187_v27 = vpack.c.bf16 %v1155_v18, %v1155_v18  ;;  %v643_v18 = vcvt.s32.f32 %v579_v8  ;;  %v645_v19 = vcvt.s32.f32 %v581_v9 }
 0x132   : > { %v805_v60 = vpop.f32.mrf.mxu0  ;;  %v1251_v34 = vunpack.c.l.b16 %v1187_v27  ;;  %v679_v26 = vpack.c.bf16 %v645_v19, %v643_v18  ;;  %1578 = vmatmul.bf16.gmra.mxu3 %v4683_v21 }
 0x133   : > { %v894_v23 = vpop.f32.mrf.mxu1 }
 0x134   : > { %v895_v24 = vadd.f32 %v894_v23, %v805_v60  ;;  %v644_v23 = vcvt.s32.f32 %v580_v11  ;;  %v1057_v41 = vpop.permute.xlu1 %1056 }
 0x136   : > { %v1156_v28 = vmul.f32 %v1027_v25, %v895_v24  ;;  %v646_v24 = vcvt.s32.f32 %v582_v12 }
 0x138   : > { %v1188_v31 = vpack.c.bf16 %v1156_v28, %v1156_v28  ;;  %v680_v3 = vpack.c.bf16 %v646_v24, %v644_v23 }
 0x13a   : > { %v1252_v35 = vunpack.c.l.b16 %v1188_v31  ;;  %v808_v36 = vpop.f32.mrf.mxu0 }
 0x13b   : > { %v897_v37 = vpop.f32.mrf.mxu1 }
 0x13c   : > { %v1280_v38 = vpack.c.b16 %v1252_v35, %v1251_v34  ;;  %v898_v39 = vadd.f32 %v897_v37, %v808_v36  ;;  %v583_v34 = vunpack.c.2.s8 %v521_v5  ;;  %v585_v35 = vunpack.c.3.s8 %v521_v5 }
 0x13d   : > { %847 = vmatmul.bf16.gmra.mxu0 %v675_v32  ;;  %v584_v37 = vunpack.c.2.s8 %v522_v6 }
 0x13e   : > { %936 = vmatmul.bf16.gmra.mxu1 %v676_v33  ;;  %1464 = vmatmul.bf16.gmra.mxu2 %v1280_v38  ;;  %v1157_v43 = vmul.f32 %v1032_v40, %v898_v39  ;;  %v1052_v33 = vpop.permute.xlu0 %1051  ;;  %v586_v38 = vunpack.c.3.s8 %v522_v6  ;;  %v647_v42 = vcvt.s32.f32 %v583_v34 }
 0x140   : > { %v1189_v50 = vpack.c.bf16 %v1157_v43, %v1157_v43  ;;  %v649_v43 = vcvt.s32.f32 %v585_v35 }
 0x142   : > { %v810_v45 = vpop.f32.mrf.mxu0  ;;  %v1253_v59 = vunpack.c.l.b16 %v1189_v50  ;;  %1583 = vmatmul.bf16.gmra.mxu3 %v4675_v15 }
 0x143   : > { %v899_v46 = vpop.f32.mrf.mxu1 }
 0x144   : > { %v900_v58 = vadd.f32 %v899_v46, %v810_v45  ;;  %v648_v45 = vcvt.s32.f32 %v584_v37  ;;  %v650_v46 = vcvt.s32.f32 %v586_v38 }
 0x146   : > { %v1158_v52 = vmul.f32 %v1037_v47, %v900_v58  ;;  %v681_v47 = vpack.c.bf16 %v649_v43, %v647_v42  ;;  %v682_v48 = vpack.c.bf16 %v650_v46, %v648_v45 }
 0x148   : > { %v1190_v55 = vpack.c.bf16 %v1158_v52, %v1158_v52 }
 0x14a   : > { %v1254_v61 = vunpack.c.l.b16 %v1190_v55  ;;  %v813_v62 = vpop.f32.mrf.mxu0  ;;  %v1539_v55 = vpop.f32.mrf.mxu3 }
 0x14b   : > { %v902_v14 = vpop.f32.mrf.mxu1 }
 0x14c   : > { %v1281_v63 = vpack.c.b16 %v1254_v61, %v1253_v59  ;;  %v903_v0 = vadd.f32 %v902_v14, %v813_v62 }
 0x14d   : > { %852 = vmatmul.bf16.gmra.mxu0 %v677_v56 }
 0x14e   : > { %941 = vmatmul.bf16.gmra.mxu1 %v678_v57  ;;  %1469 = vmatmul.bf16.gmra.mxu2 %v1281_v63  ;;  %v1159_v10 = vmul.f32 %v1042_v7, %v903_v0  ;;  %v1062_v57 = vpop.permute.xlu2 %1061  ;;  %v1067_v0 = vpop.permute.xlu0 %1066 }
 0x150   : > { %v1191_v22 = vpack.c.bf16 %v1159_v10, %v1159_v10 }
 0x152   : > { %v815_v53 = vpop.f32.mrf.mxu0  ;;  %v1255_v27 = vunpack.c.l.b16 %v1191_v22  ;;  %v1541_v63 = vpop.f32.mrf.mxu3  ;;  %1588 = vmatmul.bf16.gmra.mxu3 %v4658_v4 }
 0x153   : > { %v904_v13 = vpop.f32.mrf.mxu1 }
 0x154   : > { %v905_v16 = vadd.f32 %v904_v13, %v815_v53  ;;  %v1072_v13 = vpop.permute.xlu1 %1071 }
 0x156   : > { %v1160_v60 = vmul.f32 %v1047_v17, %v905_v16 }
 0x158   : > { %v1192_v25 = vpack.c.bf16 %v1160_v60, %v1160_v60  ;;  %v1077_v60 = vpop.permute.xlu2 %1076 }
 0x15a   : > { %v1256_v28 = vunpack.c.l.b16 %v1192_v25  ;;  %v818_v29 = vpop.f32.mrf.mxu0  ;;  %v1544_v12 = vpop.f32.mrf.mxu3 }
 0x15b   : > { %v907_v30 = vpop.f32.mrf.mxu1 }
 0x15c   : > { %v1282_v31 = vpack.c.b16 %v1256_v28, %v1255_v27  ;;  %v908_v32 = vadd.f32 %v907_v30, %v818_v29 }
 0x15d   : > { %857 = vmatmul.bf16.gmra.mxu0 %v679_v26 }
 0x15e   : > { %946 = vmatmul.bf16.gmra.mxu1 %v680_v3  ;;  %1474 = vmatmul.bf16.gmra.mxu2 %v1282_v31  ;;  %v1161_v36 = vmul.f32 %v1052_v33, %v908_v32  ;;  %v4786_v31 = vld [vmem:[%s371_s24] ss:$0 sm:$0xff]  ;;  %v1082_v32 = vpop.permute.xlu0 %1081 }
 0x160   : > { %v1193_v20 = vpack.c.bf16 %v1161_v36, %v1161_v36 }
 0x162   : > { %v820_v39 = vpop.f32.mrf.mxu0  ;;  %v1257_v49 = vunpack.c.l.b16 %v1193_v20  ;;  %v4776_v22 = vpop.f32.mrf.mxu3  ;;  %1593 = vmatmul.bf16.gmra.mxu3 %v4650_v2 }
 0x163   : > { %v909_v40 = vpop.f32.mrf.mxu1 }
 0x164   : > { %v910_v51 = vadd.f32 %v909_v40, %v820_v39  ;;  %v1087_v39 = vpop.permute.xlu1 %1086 }
 0x166   : > { %v1162_v44 = vmul.f32 %v1057_v41, %v910_v51 }
 0x168   : > { %v1194_v58 = vpack.c.bf16 %v1162_v44, %v1162_v44 }
 0x16a   : > { %v1258_v50 = vunpack.c.l.b16 %v1194_v58  ;;  %v823_v52 = vpop.f32.mrf.mxu0  ;;  %v4779_v29 = vpop.f32.mrf.mxu3 }
 0x16b   : > { %v912_v1 = vpop.f32.mrf.mxu1 }
 0x16c   : > { %v1283_v54 = vpack.c.b16 %v1258_v50, %v1257_v49  ;;  %v913_v56 = vadd.f32 %v912_v1, %v823_v52  ;;  %v1092_v1 = vpop.permute.xlu2 %1091 }
 0x16d   : > { %862 = vmatmul.bf16.gmra.mxu0 %v681_v47 }
 0x16e   : > { %951 = vmatmul.bf16.gmra.mxu1 %v682_v48  ;;  %1479 = vmatmul.bf16.gmra.mxu2 %v1283_v54  ;;  %v1163_v59 = vmul.f32 %v1062_v57, %v913_v56 }
 0x170   : > { %v1195_v21 = vpack.c.bf16 %v1163_v59, %v1163_v59 }
 0x172   : > { %v825_v61 = vpop.f32.mrf.mxu0  ;;  %v1259_v7 = vunpack.c.l.b16 %v1195_v21  ;;  %v4789_v38 = vpop.f32.mrf.mxu3 }
 0x173   : > { %v914_v62 = vpop.f32.mrf.mxu1 }
 0x174   : > { %v915_v14 = vadd.f32 %v914_v62, %v825_v61  ;;  %v1097_v62 = vpop.permute.xlu0 %1096 }
 0x176   : > { %v1164_v5 = vmul.f32 %v1067_v0, %v915_v14 }
 0x178   : > { %v1196_v6 = vpack.c.bf16 %v1164_v5, %v1164_v5  ;;  %v4111_v5 = vld [vmem:[%s4606_s18 + $0x60] sm:$0xff] }
 0x179   : > { %1598 = vmatmul.bf16.gmra.mxu3 %v4111_v5 }
 0x17a   : > { %v1260_v8 = vunpack.c.l.b16 %v1196_v6  ;;  %v828_v9 = vpop.f32.mrf.mxu0  ;;  %v4794_v48 = vpop.f32.mrf.mxu3 }
 0x17b   : > { %v917_v10 = vpop.f32.mrf.mxu1 }
 0x17c   : > { %v1284_v11 = vpack.c.b16 %v1260_v8, %v1259_v7  ;;  %v918_v53 = vadd.f32 %v917_v10, %v828_v9 }
 0x17e   : > { %1484 = vmatmul.bf16.gmra.mxu2 %v1284_v11  ;;  %v1165_v16 = vmul.f32 %v1072_v13, %v918_v53 }
 0x180   : > { %v1197_v23 = vpack.c.bf16 %v1165_v16, %v1165_v16 }
 0x182   : > { %v830_v17 = vpop.f32.mrf.mxu0  ;;  %v1261_v25 = vunpack.c.l.b16 %v1197_v23  ;;  %v4799_v61 = vpop.f32.mrf.mxu3 }
 0x183   : > { %v919_v18 = vpop.f32.mrf.mxu1 }
 0x184   : > { %v920_v19 = vadd.f32 %v919_v18, %v830_v17  ;;  %v1102_v18 = vpop.permute.xlu1 %1101 }
 0x186   : > { %v1166_v24 = vmul.f32 %v1077_v60, %v920_v19 }
 0x188   : > { %v1198_v15 = vpack.c.bf16 %v1166_v24, %v1166_v24 }
 0x18a   : > { %v1262_v26 = vunpack.c.l.b16 %v1198_v15  ;;  %v833_v3 = vpop.f32.mrf.mxu0  ;;  %v4804_v13 = vpop.f32.mrf.mxu3 }
 0x18b   : > { %v922_v27 = vpop.f32.mrf.mxu1 }
 0x18c   : > { %v1285_v28 = vpack.c.b16 %v1262_v26, %v1261_v25  ;;  %v923_v30 = vadd.f32 %v922_v27, %v833_v3  ;;  %v1107_v3 = vpop.permute.xlu2 %1106 }
 0x18e   : > { %1489 = vmatmul.bf16.gmra.mxu2 %v1285_v28  ;;  %v1167_v33 = vmul.f32 %v1082_v32, %v923_v30  ;;  %v4112_v32 = vld [vmem:[%s4606_s18 + $0x68] sm:$0xff] }
 0x18f   : > { %1603 = vmatmul.bf16.gmra.mxu3 %v4112_v32 }
 0x190   : > { %v1199_v51 = vpack.c.bf16 %v1167_v33, %v1167_v33 }
 0x191   : > { %v1450_v34 = vpop.f32.mrf.mxu2 }
 0x192   : > { %v1451_v4 = vadd.f32 %v4786_v31, %v1450_v34  ;;  %v835_v35 = vpop.f32.mrf.mxu0  ;;  %v1263_v20 = vunpack.c.l.b16 %v1199_v51  ;;  %v4810_v26 = vpop.f32.mrf.mxu3 }
 0x193   : > { %v924_v36 = vpop.f32.mrf.mxu1 }
 0x194   : > { %v925_v37 = vadd.f32 %v924_v36, %v835_v35  ;;  %v1540_v40 = vadd.f32 %v1539_v55, %v1451_v4  ;;  %v1122_v5 = vpop.permute.xlu2 %1121 }
 0x196   : > { %v1168_v41 = vmul.f32 %v1087_v39, %v925_v37  ;;  %1619 = vst [vmem:[%s4499_s11] sm:$0xff] %v1540_v40 }
 0x198   : > { %v1200_v42 = vpack.c.bf16 %v1168_v41, %v1168_v41 }
 0x199   : > { %v1452_v43 = vpop.f32.mrf.mxu2 }
 0x19a   : > { %v1264_v44 = vunpack.c.l.b16 %v1200_v42  ;;  %v1453_v45 = vadd.f32 %v4786_v31, %v1452_v43  ;;  %v838_v46 = vpop.f32.mrf.mxu0  ;;  %v1112_v42 = vpop.permute.xlu0 %1111 }
 0x19b   : > { %v927_v58 = vpop.f32.mrf.mxu1 }
 0x19c   : > { %v1286_v47 = vpack.c.b16 %v1264_v44, %v1263_v20  ;;  %v1542_v49 = vadd.f32 %v1541_v63, %v1453_v45  ;;  %v928_v50 = vadd.f32 %v927_v58, %v838_v46 }
 0x19e   : > { %1620 = vst [vmem:[%s4499_s11 + $0x8] sm:$0xff] %v1542_v49  ;;  %v3918_v52 = vpack.c.bf16 %v1542_v49, %v1540_v40  ;;  %1494 = vmatmul.bf16.gmra.mxu2 %v1286_v47  ;;  %v1169_v2 = vmul.f32 %v1092_v1, %v928_v50  ;;  %v4816_v40 = vpop.f32.mrf.mxu3  ;;  %v1117_v49 = vpop.permute.xlu1 %1116 }
 0x1a0   : > { %4010 = vst [vmem:[%s4606_s18 + $0x80] sm:$0xff] %v3918_v52   ;;  %v1201_v63 = vpack.c.bf16 %v1169_v2, %v1169_v2  ;;  %v4113_v2 = vld [vmem:[%s4606_s18 + $0x70] sm:$0xff] }
 0x1a1   : > { %v1455_v54 = vpop.f32.mrf.mxu2  ;;  %1608 = vmatmul.bf16.gmra.mxu3 %v4113_v2 }
 0x1a2   : > { %v1456_v55 = vadd.f32 %v4786_v31, %v1455_v54  ;;  %v840_v56 = vpop.f32.mrf.mxu0  ;;  %v1265_v7 = vunpack.c.l.b16 %v1201_v63 }
 0x1a3   : > { %v929_v57 = vpop.f32.mrf.mxu1 }
 0x1a4   : > { %v930_v59 = vadd.f32 %v929_v57, %v840_v56  ;;  %v1545_v14 = vadd.f32 %v1544_v12, %v1456_v55 }
 0x1a6   : > { %v1170_v0 = vmul.f32 %v1097_v62, %v930_v59  ;;  %1621 = vst [vmem:[%s4499_s11 + $0x10] sm:$0xff] %v1545_v14  ;;  %v4822_v47 = vpop.f32.mrf.mxu3 }
 0x1a8   : > { %v1202_v21 = vpack.c.bf16 %v1170_v0, %v1170_v0 }
 0x1a9   : > { %v1457_v6 = vpop.f32.mrf.mxu2 }
 0x1aa   : > { %v1266_v8 = vunpack.c.l.b16 %v1202_v21  ;;  %v1458_v9 = vadd.f32 %v4786_v31, %v1457_v6  ;;  %v843_v10 = vpop.f32.mrf.mxu0 }
 0x1ab   : > { %v932_v11 = vpop.f32.mrf.mxu1 }
 0x1ac   : > { %v1287_v53 = vpack.c.b16 %v1266_v8, %v1265_v7  ;;  %v1547_v12 = vadd.f32 %v4776_v22, %v1458_v9  ;;  %v933_v16 = vadd.f32 %v932_v11, %v843_v10 }
 0x1ae   : > { %1622 = vst [vmem:[%s4499_s11 + $0x18] sm:$0xff] %v1547_v12  ;;  %v3923_v17 = vpack.c.bf16 %v1547_v12, %v1545_v14  ;;  %1499 = vmatmul.bf16.gmra.mxu2 %v1287_v53  ;;  %v1171_v19 = vmul.f32 %v1102_v18, %v933_v16  ;;  %v1127_v53 = vpop.permute.xlu0 %1126 }
 0x1b0   : > { %4011 = vst [vmem:[%s4606_s18 + $0x88] sm:$0xff] %v3923_v17   ;;  %v1203_v27 = vpack.c.bf16 %v1171_v19, %v1171_v19  ;;  %v4114_v19 = vld [vmem:[%s4606_s18 + $0x78] sm:$0xff] }
 0x1b1   : > { %v1460_v60 = vpop.f32.mrf.mxu2  ;;  %1613 = vmatmul.bf16.gmra.mxu3 %v4114_v19 }
 0x1b2   : > { %v1461_v23 = vadd.f32 %v4786_v31, %v1460_v60  ;;  %v845_v24 = vpop.f32.mrf.mxu0  ;;  %v1267_v34 = vunpack.c.l.b16 %v1203_v27 }
 0x1b3   : > { %v934_v15 = vpop.f32.mrf.mxu1 }
 0x1b4   : > { %v935_v25 = vadd.f32 %v934_v15, %v845_v24  ;;  %v1550_v22 = vadd.f32 %v4779_v29, %v1461_v23 }
 0x1b6   : > { %v1172_v28 = vmul.f32 %v1107_v3, %v935_v25  ;;  %1623 = vst [vmem:[%s4499_s11 + $0x20] sm:$0xff] %v1550_v22 }
 0x1b8   : > { %v1204_v30 = vpack.c.bf16 %v1172_v28, %v1172_v28 }
 0x1b9   : > { %v1462_v33 = vpop.f32.mrf.mxu2 }
 0x1ba   : > { %v1268_v4 = vunpack.c.l.b16 %v1204_v30  ;;  %v1463_v35 = vadd.f32 %v4786_v31, %v1462_v33  ;;  %v848_v36 = vpop.f32.mrf.mxu0  ;;  %v1132_v30 = vpop.permute.xlu1 %1131 }
 0x1bb   : > { %v937_v37 = vpop.f32.mrf.mxu1 }
 0x1bc   : > { %v1288_v39 = vpack.c.b16 %v1268_v4, %v1267_v34  ;;  %v1552_v29 = vadd.f32 %v4789_v38, %v1463_v35  ;;  %v938_v51 = vadd.f32 %v937_v37, %v848_v36 }
 0x1be   : > { %1624 = vst [vmem:[%s4499_s11 + $0x28] sm:$0xff] %v1552_v29  ;;  %v3928_v41 = vpack.c.bf16 %v1552_v29, %v1550_v22  ;;  %1504 = vmatmul.bf16.gmra.mxu2 %v1288_v39  ;;  %v1173_v43 = vmul.f32 %v1112_v42, %v938_v51  ;;  %v1137_v39 = vpop.permute.xlu2 %1136 }
 0x1c0   : > { %4012 = vst [vmem:[%s4606_s18 + $0x90] sm:$0xff] %v3928_v41   ;;  %v1205_v50 = vpack.c.bf16 %v1173_v43, %v1173_v43 }
 0x1c1   : > { %v1465_v20 = vpop.f32.mrf.mxu2 }
 0x1c2   : > { %v1466_v44 = vadd.f32 %v4786_v31, %v1465_v20  ;;  %v850_v45 = vpop.f32.mrf.mxu0  ;;  %v1269_v54 = vunpack.c.l.b16 %v1205_v50 }
 0x1c3   : > { %v939_v46 = vpop.f32.mrf.mxu1 }
 0x1c4   : > { %v940_v58 = vadd.f32 %v939_v46, %v850_v45  ;;  %v1555_v38 = vadd.f32 %v4794_v48, %v1466_v44  ;;  %v4829_v48 = vpop.f32.mrf.mxu3 }
 0x1c6   : > { %v1174_v52 = vmul.f32 %v1117_v49, %v940_v58  ;;  %1625 = vst [vmem:[%s4499_s11 + $0x30] sm:$0xff] %v1555_v38 }
 0x1c8   : > { %v1206_v1 = vpack.c.bf16 %v1174_v52, %v1174_v52  ;;  %v1142_v52 = vpop.permute.xlu0 %1141 }
 0x1c9   : > { %v1467_v56 = vpop.f32.mrf.mxu2 }
 0x1ca   : > { %v1270_v55 = vunpack.c.l.b16 %v1206_v1  ;;  %v1468_v57 = vadd.f32 %v4786_v31, %v1467_v56  ;;  %v853_v59 = vpop.f32.mrf.mxu0 }
 0x1cb   : > { %v942_v62 = vpop.f32.mrf.mxu1 }
 0x1cc   : > { %v1289_v14 = vpack.c.b16 %v1270_v55, %v1269_v54  ;;  %v1557_v63 = vadd.f32 %v4799_v61, %v1468_v57  ;;  %v943_v0 = vadd.f32 %v942_v62, %v853_v59  ;;  %v4836_v18 = vpop.f32.mrf.mxu3  ;;  %v1147_v59 = vpop.permute.xlu1 %1146 }
 0x1ce   : > { %1626 = vst [vmem:[%s4499_s11 + $0x38] sm:$0xff] %v1557_v63  ;;  %v3933_v21 = vpack.c.bf16 %v1557_v63, %v1555_v38  ;;  %1509 = vmatmul.bf16.gmra.mxu2 %v1289_v14  ;;  %v1175_v6 = vmul.f32 %v1122_v5, %v943_v0 }
 0x1d0   : > { %4013 = vst [vmem:[%s4606_s18 + $0x98] sm:$0xff] %v3933_v21   ;;  %v1207_v12 = vpack.c.bf16 %v1175_v6, %v1175_v6 }
 0x1d1   : > { %v1470_v7 = vpop.f32.mrf.mxu2 }
 0x1d2   : > { %v1471_v8 = vadd.f32 %v4786_v31, %v1470_v7  ;;  %v855_v9 = vpop.f32.mrf.mxu0  ;;  %v1271_v60 = vunpack.c.l.b16 %v1207_v12 }
 0x1d3   : > { %v944_v10 = vpop.f32.mrf.mxu1 }
 0x1d4   : > { %v945_v11 = vadd.f32 %v944_v10, %v855_v9  ;;  %v1560_v61 = vadd.f32 %v4804_v13, %v1471_v8  ;;  %v1574_v34 = vpop.f32.mrf.mxu3 }
 0x1d6   : > { %v1176_v16 = vmul.f32 %v1127_v53, %v945_v11  ;;  %1627 = vst [vmem:[%s4499_s11 + $0x40] sm:$0xff] %v1560_v61 }
 0x1d8   : > { %v1208_v17 = vpack.c.bf16 %v1176_v16, %v1176_v16 }
 0x1d9   : > { %v1472_v24 = vpop.f32.mrf.mxu2 }
 0x1da   : > { %v1272_v23 = vunpack.c.l.b16 %v1208_v17  ;;  %v1473_v15 = vadd.f32 %v4786_v31, %v1472_v24  ;;  %v858_v25 = vpop.f32.mrf.mxu0 }
 0x1db   : > { %v947_v3 = vpop.f32.mrf.mxu1 }
 0x1dc   : > { %v1290_v22 = vpack.c.b16 %v1272_v23, %v1271_v60  ;;  %v1562_v13 = vadd.f32 %v4810_v26, %v1473_v15  ;;  %v948_v27 = vadd.f32 %v947_v3, %v858_v25  ;;  %v1576_v49 = vpop.f32.mrf.mxu3 }
 0x1de   : > { %1628 = vst [vmem:[%s4499_s11 + $0x48] sm:$0xff] %v1562_v13  ;;  %v3938_v28 = vpack.c.bf16 %v1562_v13, %v1560_v61  ;;  %1514 = vmatmul.bf16.gmra.mxu2 %v1290_v22  ;;  %v1177_v32 = vmul.f32 %v1132_v30, %v948_v27 }
 0x1e0   : > { %4014 = vst [vmem:[%s4606_s18 + $0xa0] sm:$0xff] %v3938_v28   ;;  %v1209_v26 = vpack.c.bf16 %v1177_v32, %v1177_v32 }
 0x1e1   : > { %v1475_v33 = vpop.f32.mrf.mxu2 }
 0x1e2   : > { %v1476_v4 = vadd.f32 %v4786_v31, %v1475_v33  ;;  %v860_v35 = vpop.f32.mrf.mxu0  ;;  %v1273_v42 = vunpack.c.l.b16 %v1209_v26 }
 0x1e3   : > { %v949_v36 = vpop.f32.mrf.mxu1 }
 0x1e4   : > { %v950_v37 = vadd.f32 %v949_v36, %v860_v35  ;;  %v1565_v29 = vadd.f32 %v4816_v40, %v1476_v4  ;;  %v1579_v63 = vpop.f32.mrf.mxu3 }
 0x1e6   : > { %v1178_v51 = vmul.f32 %v1137_v39, %v950_v37  ;;  %1629 = vst [vmem:[%s4499_s11 + $0x50] sm:$0xff] %v1565_v29 }
 0x1e8   : > { %v1210_v41 = vpack.c.bf16 %v1178_v51, %v1178_v51 }
 0x1e9   : > { %v1477_v20 = vpop.f32.mrf.mxu2 }
 0x1ea   : > { %v1274_v43 = vunpack.c.l.b16 %v1210_v41  ;;  %v1478_v44 = vadd.f32 %v4786_v31, %v1477_v20  ;;  %v863_v45 = vpop.f32.mrf.mxu0 }
 0x1eb   : > { %v952_v46 = vpop.f32.mrf.mxu1 }
 0x1ec   : > { %v1291_v58 = vpack.c.b16 %v1274_v43, %v1273_v42  ;;  %v1567_v38 = vadd.f32 %v4822_v47, %v1478_v44  ;;  %v953_v50 = vadd.f32 %v952_v46, %v863_v45 }
 0x1ee   : > { %1630 = vst [vmem:[%s4499_s11 + $0x58] sm:$0xff] %v1567_v38  ;;  %v3943_v40 = vpack.c.bf16 %v1567_v38, %v1565_v29  ;;  %1519 = vmatmul.bf16.gmra.mxu2 %v1291_v58  ;;  %v1179_v1 = vmul.f32 %v1142_v52, %v953_v50 }
 0x1f0   : > { %4015 = vst [vmem:[%s4606_s18 + $0xa8] sm:$0xff] %v3943_v40   ;;  %v1211_v47 = vpack.c.bf16 %v1179_v1, %v1179_v1 }
 0x1f1   : > { %v1480_v2 = vpop.f32.mrf.mxu2 }
 0x1f2   : > { %v1481_v54 = vadd.f32 %v4786_v31, %v1480_v2  ;;  %v865_v55 = vpop.f32.mrf.mxu0  ;;  %v1275_v21 = vunpack.c.l.b16 %v1211_v47 }
 0x1f3   : > { %v954_v56 = vpop.f32.mrf.mxu1 }
 0x1f4   : > { %v955_v57 = vadd.f32 %v954_v56, %v865_v55  ;;  %v1570_v62 = vadd.f32 %v4829_v48, %v1481_v54  ;;  %v1581_v48 = vpop.f32.mrf.mxu3 }
 0x1f6   : > { %v1180_v14 = vmul.f32 %v1147_v59, %v955_v57  ;;  %1631 = vst [vmem:[%s4499_s11 + $0x60] sm:$0xff] %v1570_v62 }
 0x1f8   : > { %v1212_v0 = vpack.c.bf16 %v1180_v14, %v1180_v14 }
 0x1f9   : > { %v1482_v6 = vpop.f32.mrf.mxu2 }
 0x1fa   : > { %v1276_v5 = vunpack.c.l.b16 %v1212_v0  ;;  %v1483_v7 = vadd.f32 %v4786_v31, %v1482_v6 }
 0x1fc   : > { %v1292_v8 = vpack.c.b16 %v1276_v5, %v1275_v21  ;;  %v1572_v9 = vadd.f32 %v4836_v18, %v1483_v7  ;;  %v1584_v16 = vpop.f32.mrf.mxu3 }
 0x1fe   : > { %1632 = vst [vmem:[%s4499_s11 + $0x68] sm:$0xff] %v1572_v9  ;;  %v3948_v10 = vpack.c.bf16 %v1572_v9, %v1570_v62  ;;  %1524 = vmatmul.bf16.gmra.mxu2 %v1292_v8 }
 0x200   : > { %4016 = vst [vmem:[%s4606_s18 + $0xb0] sm:$0xff] %v3948_v10  }
 0x201   : > { %v1485_v11 = vpop.f32.mrf.mxu2 }
 0x202   : > { %v1486_v53 = vadd.f32 %v4786_v31, %v1485_v11 }
 0x204   : > { %v1575_v61 = vadd.f32 %v1574_v34, %v1486_v53  ;;  %v1586_v24 = vpop.f32.mrf.mxu3 }
 0x206   : > { %1633 = vst [vmem:[%s4499_s11 + $0x70] sm:$0xff] %v1575_v61 }
 0x209   : > { %v1487_v12 = vpop.f32.mrf.mxu2 }
 0x20a   : > { %v1488_v17 = vadd.f32 %v4786_v31, %v1487_v12 }
 0x20c   : > { %v1577_v19 = vadd.f32 %v1576_v49, %v1488_v17  ;;  %v1589_v13 = vpop.f32.mrf.mxu3 }
 0x20e   : > { %1634 = vst [vmem:[%s4499_s11 + $0x78] sm:$0xff] %v1577_v19  ;;  %v3953_v18 = vpack.c.bf16 %v1577_v19, %v1575_v61 }
 0x210   : > { %4017 = vst [vmem:[%s4606_s18 + $0xb8] sm:$0xff] %v3953_v18  }
 0x211   : > { %v1490_v60 = vpop.f32.mrf.mxu2 }
 0x212   : > { %v1491_v23 = vadd.f32 %v4786_v31, %v1490_v60 }
 0x214   : > { %v1580_v15 = vadd.f32 %v1579_v63, %v1491_v23  ;;  %v1591_v33 = vpop.f32.mrf.mxu3 }
 0x216   : > { %1635 = vst [vmem:[%s4499_s11 + $0x80] sm:$0xff] %v1580_v15 }
 0x219   : > { %v1492_v25 = vpop.f32.mrf.mxu2 }
 0x21a   : > { %v1493_v3 = vadd.f32 %v4786_v31, %v1492_v25 }
 0x21c   : > { %v1582_v22 = vadd.f32 %v1581_v48, %v1493_v3  ;;  %v1594_v39 = vpop.f32.mrf.mxu3 }
 0x21e   : > { %1636 = vst [vmem:[%s4499_s11 + $0x88] sm:$0xff] %v1582_v22  ;;  %v3958_v27 = vpack.c.bf16 %v1582_v22, %v1580_v15 }
 0x220   : > { %4018 = vst [vmem:[%s4606_s18 + $0xc0] sm:$0xff] %v3958_v27  }
 0x221   : > { %v1495_v28 = vpop.f32.mrf.mxu2 }
 0x222   : > { %v1496_v30 = vadd.f32 %v4786_v31, %v1495_v28 }
 0x224   : > { %v1585_v32 = vadd.f32 %v1584_v16, %v1496_v30  ;;  %v1596_v42 = vpop.f32.mrf.mxu3 }
 0x226   : > { %1637 = vst [vmem:[%s4499_s11 + $0x90] sm:$0xff] %v1585_v32 }
 0x229   : > { %v1497_v34 = vpop.f32.mrf.mxu2 }
 0x22a   : > { %v1498_v4 = vadd.f32 %v4786_v31, %v1497_v34 }
 0x22c   : > { %v1587_v35 = vadd.f32 %v1586_v24, %v1498_v4  ;;  %v1599_v58 = vpop.f32.mrf.mxu3 }
 0x22e   : > { %1638 = vst [vmem:[%s4499_s11 + $0x98] sm:$0xff] %v1587_v35  ;;  %v3963_v36 = vpack.c.bf16 %v1587_v35, %v1585_v32 }
 0x230   : > { %4019 = vst [vmem:[%s4606_s18 + $0xc8] sm:$0xff] %v3963_v36  }
 0x231   : > { %v1500_v37 = vpop.f32.mrf.mxu2 }
 0x232   : > { %v1501_v29 = vadd.f32 %v4786_v31, %v1500_v37 }
 0x234   : > { %v1590_v26 = vadd.f32 %v1589_v13, %v1501_v29  ;;  %v1601_v52 = vpop.f32.mrf.mxu3 }
 0x236   : > { %1639 = vst [vmem:[%s4499_s11 + $0xa0] sm:$0xff] %v1590_v26 }
 0x239   : > { %v1502_v51 = vpop.f32.mrf.mxu2 }
 0x23a   : > { %v1503_v41 = vadd.f32 %v4786_v31, %v1502_v51 }
 0x23c   : > { %v1592_v43 = vadd.f32 %v1591_v33, %v1503_v41  ;;  %v1604_v56 = vpop.f32.mrf.mxu3 }
 0x23e   : > { %1640 = vst [vmem:[%s4499_s11 + $0xa8] sm:$0xff] %v1592_v43  ;;  %v3968_v20 = vpack.c.bf16 %v1592_v43, %v1590_v26 }
 0x240   : > { %4020 = vst [vmem:[%s4606_s18 + $0xd0] sm:$0xff] %v3968_v20  }
 0x241   : > { %v1505_v44 = vpop.f32.mrf.mxu2 }
 0x242   : > { %v1506_v45 = vadd.f32 %v4786_v31, %v1505_v44 }
 0x244   : > { %v1595_v46 = vadd.f32 %v1594_v39, %v1506_v45  ;;  %v1606_v63 = vpop.f32.mrf.mxu3 }
 0x246   : > { %1641 = vst [vmem:[%s4499_s11 + $0xb0] sm:$0xff] %v1595_v46 }
 0x249   : > { %v1507_v49 = vpop.f32.mrf.mxu2 }
 0x24a   : > { %v1508_v38 = vadd.f32 %v4786_v31, %v1507_v49 }
 0x24c   : > { %v1597_v50 = vadd.f32 %v1596_v42, %v1508_v38  ;;  %v1609_v7 = vpop.f32.mrf.mxu3 }
 0x24e   : > { %1642 = vst [vmem:[%s4499_s11 + $0xb8] sm:$0xff] %v1597_v50  ;;  %v3973_v40 = vpack.c.bf16 %v1597_v50, %v1595_v46 }
 0x250   : > { %4021 = vst [vmem:[%s4606_s18 + $0xd8] sm:$0xff] %v3973_v40  }
 0x251   : > { %v1510_v1 = vpop.f32.mrf.mxu2 }
 0x252   : > { %v1511_v2 = vadd.f32 %v4786_v31, %v1510_v1 }
 0x254   : > { %v1600_v54 = vadd.f32 %v1599_v58, %v1511_v2  ;;  %v1611_v11 = vpop.f32.mrf.mxu3 }
 0x256   : > { %1643 = vst [vmem:[%s4499_s11 + $0xc0] sm:$0xff] %v1600_v54 }
 0x259   : > { %v1512_v55 = vpop.f32.mrf.mxu2 }
 0x25a   : > { %v1513_v57 = vadd.f32 %v4786_v31, %v1512_v55 }
 0x25c   : > { %v1602_v59 = vadd.f32 %v1601_v52, %v1513_v57  ;;  %v1614_v17 = vpop.f32.mrf.mxu3 }
 0x25e   : > { %1644 = vst [vmem:[%s4499_s11 + $0xc8] sm:$0xff] %v1602_v59  ;;  %v3978_v62 = vpack.c.bf16 %v1602_v59, %v1600_v54 }
 0x260   : > { %4022 = vst [vmem:[%s4606_s18 + $0xe0] sm:$0xff] %v3978_v62  }
 0x261   : > { %v1515_v47 = vpop.f32.mrf.mxu2 }
 0x262   : > { %v1516_v14 = vadd.f32 %v4786_v31, %v1515_v47 }
 0x264   : > { %v1605_v0 = vadd.f32 %v1604_v56, %v1516_v14  ;;  %v1616_v15 = vpop.f32.mrf.mxu3 }
 0x266   : > { %1645 = vst [vmem:[%s4499_s11 + $0xd0] sm:$0xff] %v1605_v0 }
 0x269   : > { %v1517_v21 = vpop.f32.mrf.mxu2 }
 0x26a   : > { %v1518_v5 = vadd.f32 %v4786_v31, %v1517_v21 }
 0x26c   : > { %v1607_v6 = vadd.f32 %v1606_v63, %v1518_v5 }
 0x26e   : > { %1646 = vst [vmem:[%s4499_s11 + $0xd8] sm:$0xff] %v1607_v6  ;;  %v3983_v8 = vpack.c.bf16 %v1607_v6, %v1605_v0 }
 0x270   : > { %4023 = vst [vmem:[%s4606_s18 + $0xe8] sm:$0xff] %v3983_v8  }
 0x271   : > { %v1520_v9 = vpop.f32.mrf.mxu2 }
 0x272   : > { %v1521_v10 = vadd.f32 %v4786_v31, %v1520_v9 }
 0x274   : > { %v1610_v48 = vadd.f32 %v1609_v7, %v1521_v10 }
 0x276   : > { %1647 = vst [vmem:[%s4499_s11 + $0xe0] sm:$0xff] %v1610_v48 }
 0x279   : > { %v1522_v53 = vpop.f32.mrf.mxu2 }
 0x27a   : > { %v1523_v61 = vadd.f32 %v4786_v31, %v1522_v53 }
 0x27c   : > { %v1612_v12 = vadd.f32 %v1611_v11, %v1523_v61 }
 0x27e   : > { %1648 = vst [vmem:[%s4499_s11 + $0xe8] sm:$0xff] %v1612_v12  ;;  %v3988_v16 = vpack.c.bf16 %v1612_v12, %v1610_v48 }
 0x280   : > { %4024 = vst [vmem:[%s4606_s18 + $0xf0] sm:$0xff] %v3988_v16  }
 0x281   : > { %v1525_v19 = vpop.f32.mrf.mxu2 }
 0x282   : > { %v1526_v18 = vadd.f32 %v4786_v31, %v1525_v19 }
 0x284   : > { %v1615_v60 = vadd.f32 %v1614_v17, %v1526_v18 }
 0x286   : > { %1649 = vst [vmem:[%s4499_s11 + $0xf0] sm:$0xff] %v1615_v60 }
 0x289   : > { %v1527_v23 = vpop.f32.mrf.mxu2 }
 0x28a   : > { %v1528_v24 = vadd.f32 %v4786_v31, %v1527_v23 }
 0x28c   : > { %v1617_v25 = vadd.f32 %v1616_v15, %v1528_v24  ;;  %1722 = sbr.rel (%p3312_p1) target bundleno = 1078 (0x436), region = 68 }
 0x28e   : > { %1650 = vst [vmem:[%s4499_s11 + $0xf8] sm:$0xff] %v1617_v25  ;;  %v3993_v3 = vpack.c.bf16 %v1617_v25, %v1615_v60 }
 0x290   : > { %4025 = vst [vmem:[%s4606_s18 + $0xf8] sm:$0xff] %v3993_v3  }
 0x291   : > { %v3785_v22 = vld [vmem:[#allocation8 + $0x78] sm:$0xff]  ;;  %v3784_v30 = vld [vmem:[#allocation8 + $0x70] sm:$0xff]  ;;  %v3783_v34 = vld [vmem:[#allocation8 + $0x68] sm:$0xff] }
 0x292   : > { %v3761_v13 = vld [vmem:[#allocation8 + $0x38] sm:$0xff]  ;;  %1965 = vmatpush.bf16.msra.mxu0 %v3785_v22  ;;  %v3760_v32 = vld [vmem:[#allocation8 + $0x30] sm:$0xff]  ;;  %v3759_v4 = vld [vmem:[#allocation8 + $0x28] sm:$0xff] }
 0x293   : > { %v3809_v27 = vld [vmem:[#allocation8 + $0xb8] sm:$0xff]  ;;  %2198 = vmatpush.bf16.msra.mxu1 %v3761_v13  ;;  %v3808_v33 = vld [vmem:[#allocation8 + $0xb0] sm:$0xff]  ;;  %v3807_v35 = vld [vmem:[#allocation8 + $0xa8] sm:$0xff] }
 0x294   : > { %v3833_v28 = vld [vmem:[#allocation8 + $0xf8] sm:$0xff]  ;;  %2481 = vmatpush.bf16.msra.mxu2 %v3809_v27  ;;  %v3832_v31 = vld [vmem:[#allocation8 + $0xf0] sm:$0xff]  ;;  %v3831_v36 = vld [vmem:[#allocation8 + $0xe8] sm:$0xff] }
 0x295   : > { %2796 = vmatpush.bf16.msra.mxu3 %v3833_v28  ;;  %v3782_v37 = vld [vmem:[#allocation8 + $0x60] sm:$0xff]  ;;  %v3781_v51 = vld [vmem:[#allocation8 + $0x58] sm:$0xff]  ;;  %v3780_v20 = vld [vmem:[#allocation8 + $0x50] sm:$0xff] }
 0x296   : > { %1966 = vmatpush.bf16.msra.mxu0 %v3784_v30  ;;  %v3758_v39 = vld [vmem:[#allocation8 + $0x20] sm:$0xff]  ;;  %v3757_v41 = vld [vmem:[#allocation8 + $0x18] sm:$0xff]  ;;  %v3756_v44 = vld [vmem:[#allocation8 + $0x10] sm:$0xff] }
 0x297   : > { %2199 = vmatpush.bf16.msra.mxu1 %v3760_v32  ;;  %v3806_v29 = vld [vmem:[#allocation8 + $0xa0] sm:$0xff]  ;;  %v3805_v42 = vld [vmem:[#allocation8 + $0x98] sm:$0xff]  ;;  %v3804_v45 = vld [vmem:[#allocation8 + $0x90] sm:$0xff] }
 0x298   : > { %2482 = vmatpush.bf16.msra.mxu2 %v3808_v33  ;;  %v3830_v26 = vld [vmem:[#allocation8 + $0xe0] sm:$0xff]  ;;  %v3829_v43 = vld [vmem:[#allocation8 + $0xd8] sm:$0xff]  ;;  %v3828_v46 = vld [vmem:[#allocation8 + $0xd0] sm:$0xff] }
 0x299   : > { %2797 = vmatpush.bf16.msra.mxu3 %v3832_v31  ;;  %v3779_v58 = vld [vmem:[#allocation8 + $0x48] sm:$0xff]  ;;  %v3778_v40 = vld [vmem:[#allocation8 + $0x40] sm:$0xff]  ;;  %v3764_v63 = vld [vmem:[#allocation2 + $0x90] sm:$0xff] }
 0x29a   : > { %1967 = vmatpush.bf16.msra.mxu0 %v3783_v34  ;;  %v3755_v49 = vld [vmem:[#allocation8 + $0x8] sm:$0xff]  ;;  %v3754_v52 = vld [vmem:[#allocation8] sm:$0xff]  ;;  %v3740_v0 = vld [vmem:[#allocation2 + $0x10] sm:$0xff] }
 0x29b   : > { %2200 = vmatpush.bf16.msra.mxu1 %v3759_v4  ;;  %v3803_v38 = vld [vmem:[#allocation8 + $0x88] sm:$0xff]  ;;  %v3802_v1 = vld [vmem:[#allocation8 + $0x80] sm:$0xff]  ;;  %v3788_v21 = vld [vmem:[#allocation2 + $0x110] sm:$0xff] }
 0x29c   : > { %2483 = vmatpush.bf16.msra.mxu2 %v3807_v35  ;;  %v3827_v50 = vld [vmem:[#allocation8 + $0xc8] sm:$0xff]  ;;  %v3826_v2 = vld [vmem:[#allocation8 + $0xc0] sm:$0xff]  ;;  %v3812_v5 = vld [vmem:[#allocation2 + $0x190] sm:$0xff] }
 0x29d   : > { %2798 = vmatpush.bf16.msra.mxu3 %v3831_v36  ;;  %v3762_v54 = vld [vmem:[#allocation2 + $0x80] sm:$0xff]  ;;  %v3763_v59 = vld [vmem:[#allocation2 + $0x88] sm:$0xff]  ;;  %v3765_v6 = vld [vmem:[#allocation2 + $0x98] sm:$0xff] }
 0x29e   : > { %1968 = vmatpush.bf16.msra.mxu0 %v3782_v37  ;;  %v3738_v55 = vld [vmem:[#allocation2] sm:$0xff]  ;;  %v3739_v62 = vld [vmem:[#allocation2 + $0x8] sm:$0xff]  ;;  %v3741_v7 = vld [vmem:[#allocation2 + $0x18] sm:$0xff] }
 0x29f   : > { %2201 = vmatpush.bf16.msra.mxu1 %v3758_v39  ;;  %v3786_v56 = vld [vmem:[#allocation2 + $0x100] sm:$0xff]  ;;  %v3787_v47 = vld [vmem:[#allocation2 + $0x108] sm:$0xff]  ;;  %v3789_v8 = vld [vmem:[#allocation2 + $0x118] sm:$0xff] }
 0x2a0   : > { %2484 = vmatpush.bf16.msra.mxu2 %v3806_v29  ;;  %v3810_v57 = vld [vmem:[#allocation2 + $0x180] sm:$0xff]  ;;  %v3811_v14 = vld [vmem:[#allocation2 + $0x188] sm:$0xff]  ;;  %v3813_v9 = vld [vmem:[#allocation2 + $0x198] sm:$0xff] }
 0x2a1   : > { %2799 = vmatpush.bf16.msra.mxu3 %v3830_v26  ;;  %v3766_v10 = vld [vmem:[#allocation2 + $0xa0] sm:$0xff]  ;;  %v3767_v61 = vld [vmem:[#allocation2 + $0xa8] sm:$0xff]  ;;  %v3768_v19 = vld [vmem:[#allocation2 + $0xb0] sm:$0xff] }
 0x2a2   : > { %1969 = vmatpush.bf16.msra.mxu0 %v3781_v51  ;;  %v3742_v48 = vld [vmem:[#allocation2 + $0x20] sm:$0xff]  ;;  %v3743_v12 = vld [vmem:[#allocation2 + $0x28] sm:$0xff]  ;;  %v3744_v18 = vld [vmem:[#allocation2 + $0x30] sm:$0xff] }
 0x2a3   : > { %2202 = vmatpush.bf16.msra.mxu1 %v3757_v41  ;;  %v3790_v11 = vld [vmem:[#allocation2 + $0x120] sm:$0xff]  ;;  %v3791_v16 = vld [vmem:[#allocation2 + $0x128] sm:$0xff]  ;;  %v3792_v60 = vld [vmem:[#allocation2 + $0x130] sm:$0xff] }
 0x2a4   : > { %2485 = vmatpush.bf16.msra.mxu2 %v3805_v42  ;;  %v3814_v53 = vld [vmem:[#allocation2 + $0x1a0] sm:$0xff]  ;;  %v3815_v17 = vld [vmem:[#allocation2 + $0x1a8] sm:$0xff]  ;;  %v3816_v23 = vld [vmem:[#allocation2 + $0x1b0] sm:$0xff] }
 0x2a5   : > { %2800 = vmatpush.bf16.msra.mxu3 %v3829_v43  ;;  %v3769_v24 = vld [vmem:[#allocation2 + $0xb8] sm:$0xff]  ;;  %v3770_v22 = vld [vmem:[#allocation2 + $0xc0] sm:$0xff]  ;;  %v3771_v42 = vld [vmem:[#allocation2 + $0xc8] sm:$0xff] }
 0x2a6   : > { %1970 = vmatpush.bf16.msra.mxu0 %v3780_v20  ;;  %v3745_v15 = vld [vmem:[#allocation2 + $0x38] sm:$0xff]  ;;  %v3746_v13 = vld [vmem:[#allocation2 + $0x40] sm:$0xff]  ;;  %v3747_v43 = vld [vmem:[#allocation2 + $0x48] sm:$0xff] }
 0x2a7   : > { %2203 = vmatpush.bf16.msra.mxu1 %v3756_v44  ;;  %v3793_v25 = vld [vmem:[#allocation2 + $0x138] sm:$0xff]  ;;  %v3794_v30 = vld [vmem:[#allocation2 + $0x140] sm:$0xff] }
 0x2a8   : > { %2486 = vmatpush.bf16.msra.mxu2 %v3804_v45  ;;  %v3817_v3 = vld [vmem:[#allocation2 + $0x1b8] sm:$0xff]  ;;  %v3818_v32 = vld [vmem:[#allocation2 + $0x1c0] sm:$0xff] }
 0x2a9   : > { %2801 = vmatpush.bf16.msra.mxu3 %v3828_v46  ;;  %v4906_v35 = vld [vmem:[%s4988_s6] ss:$0 sm:$0xff]  ;;  %v3795_v46 = vld [vmem:[#allocation2 + $0x148] sm:$0xff] }
 0x2aa   : > { %1971 = vmatpush.bf16.msra.mxu0 %v3779_v58  ;;  %v3819_v58 = vld [vmem:[#allocation2 + $0x1c8] sm:$0xff] }
 0x2ab   : > { %2204 = vmatpush.bf16.msra.mxu1 %v3755_v49 }
 0x2ac   : > { %2487 = vmatpush.bf16.msra.mxu2 %v3803_v38 }
 0x2ad   : > { %2802 = vmatpush.bf16.msra.mxu3 %v3827_v50 }
 0x2ae   : > { %1972 = vmatpush.bf16.msra.mxu0 %v3778_v40 }
 0x2af   : > { %2205 = vmatpush.bf16.msra.mxu1 %v3754_v52 }
 0x2b0   : > { %2488 = vmatpush.bf16.msra.mxu2 %v3802_v1 }
 0x2b1   : > { %2803 = vmatpush.bf16.msra.mxu3 %v3826_v2  ;;  %1973 = vmatmul.bf16.vlgmr.msra.gmra.mxu0 %v3762_v54 }
 0x2b2   : > { %2206 = vmatmul.bf16.vlgmr.msra.gmra.mxu1 %v3738_v55 }
 0x2b3   : > { %2489 = vmatmul.bf16.vlgmr.msra.gmra.mxu2 %v3786_v56 }
 0x2b4   : > { %2804 = vmatmul.bf16.vlgmr.msra.gmra.mxu3 %v3810_v57 }
 0x2c1   : > { %1978 = vmatmul.bf16.gmra.mxu0 %v3763_v59 }
 0x2c2   : > { %2211 = vmatmul.bf16.gmra.mxu1 %v3739_v62 }
 0x2c3   : > { %2494 = vmatmul.bf16.gmra.mxu2 %v3787_v47  ;;  %v3772_v47 = vld [vmem:[#allocation2 + $0xd0] sm:$0xff] }
 0x2c4   : > { %2809 = vmatmul.bf16.gmra.mxu3 %v3811_v14  ;;  %v3748_v14 = vld [vmem:[#allocation2 + $0x50] sm:$0xff] }
 0x2d1   : > { %1983 = vmatmul.bf16.gmra.mxu0 %v3764_v63 }
 0x2d2   : > { %2216 = vmatmul.bf16.gmra.mxu1 %v3740_v0 }
 0x2d3   : > { %2499 = vmatmul.bf16.gmra.mxu2 %v3788_v21 }
 0x2d4   : > { %2814 = vmatmul.bf16.gmra.mxu3 %v3812_v5  ;;  %v3796_v5 = vld [vmem:[#allocation2 + $0x150] sm:$0xff] }
 0x2e1   : > { %1988 = vmatmul.bf16.gmra.mxu0 %v3765_v6  ;;  %v3820_v6 = vld [vmem:[#allocation2 + $0x1d0] sm:$0xff] }
 0x2e2   : > { %2221 = vmatmul.bf16.gmra.mxu1 %v3741_v7 }
 0x2e3   : > { %2504 = vmatmul.bf16.gmra.mxu2 %v3789_v8 }
 0x2e4   : > { %2819 = vmatmul.bf16.gmra.mxu3 %v3813_v9 }
 0x2f1   : > { %1993 = vmatmul.bf16.gmra.mxu0 %v3766_v10 }
 0x2f2   : > { %2226 = vmatmul.bf16.gmra.mxu1 %v3742_v48 }
 0x2f3   : > { %2509 = vmatmul.bf16.gmra.mxu2 %v3790_v11 }
 0x2f4   : > { %2824 = vmatmul.bf16.gmra.mxu3 %v3814_v53 }
 0x301   : > { %1998 = vmatmul.bf16.gmra.mxu0 %v3767_v61 }
 0x302   : > { %2231 = vmatmul.bf16.gmra.mxu1 %v3743_v12 }
 0x303   : > { %2514 = vmatmul.bf16.gmra.mxu2 %v3791_v16 }
 0x304   : > { %2829 = vmatmul.bf16.gmra.mxu3 %v3815_v17 }
 0x311   : > { %2003 = vmatmul.bf16.gmra.mxu0 %v3768_v19 }
 0x312   : > { %2236 = vmatmul.bf16.gmra.mxu1 %v3744_v18 }
 0x313   : > { %2519 = vmatmul.bf16.gmra.mxu2 %v3792_v60  ;;  %v3773_v60 = vld [vmem:[#allocation2 + $0xd8] sm:$0xff] }
 0x314   : > { %2834 = vmatmul.bf16.gmra.mxu3 %v3816_v23  ;;  %v3749_v23 = vld [vmem:[#allocation2 + $0x58] sm:$0xff] }
 0x321   : > { %2008 = vmatmul.bf16.gmra.mxu0 %v3769_v24 }
 0x322   : > { %2241 = vmatmul.bf16.gmra.mxu1 %v3745_v15 }
 0x323   : > { %2524 = vmatmul.bf16.gmra.mxu2 %v3793_v25 }
 0x324   : > { %2839 = vmatmul.bf16.gmra.mxu3 %v3817_v3  ;;  %v3797_v3 = vld [vmem:[#allocation2 + $0x158] sm:$0xff] }
 0x32e   : > { %v1974_v27 = vpop.f32.mrf.mxu0 }
 0x32f   : > { %v2207_v28 = vpop.f32.mrf.mxu1 }
 0x330   : > { %v2208_v33 = vadd.f32 %v2207_v28, %v1974_v27 }
 0x331   : > { %2013 = vmatmul.bf16.gmra.mxu0 %v3770_v22  ;;  %v3821_v22 = vld [vmem:[#allocation2 + $0x1d8] sm:$0xff] }
 0x332   : > { %2246 = vmatmul.bf16.gmra.mxu1 %v3746_v13 }
 0x333   : > { %2529 = vmatmul.bf16.gmra.mxu2 %v3794_v30 }
 0x334   : > { %2844 = vmatmul.bf16.gmra.mxu3 %v3818_v32 }
 0x336   : > { %v2490_v31 = vpop.f32.mrf.mxu2  ;;  %v1976_v36 = vpop.f32.mrf.mxu0 }
 0x337   : > { %v2805_v34 = vpop.f32.mrf.mxu3  ;;  %v2570_v4 = vadd.f32 %v2490_v31, %v2208_v33  ;;  %v2209_v37 = vpop.f32.mrf.mxu1 }
 0x338   : > { %v2210_v26 = vadd.f32 %v2209_v37, %v1976_v36 }
 0x339   : > { %v2885_v39 = vadd.f32 %v2805_v34, %v2570_v4 }
 0x33b   : > { %v2921_v29 = vadd.f32 %v4906_v35, %v2885_v39 }
 0x33d   : > { %2953 = vst [vmem:[#allocation10] sm:$0xff] %v2921_v29 }
 0x33e   : > { %v2492_v51 = vpop.f32.mrf.mxu2  ;;  %v1979_v44 = vpop.f32.mrf.mxu0 }
 0x33f   : > { %v2807_v41 = vpop.f32.mrf.mxu3  ;;  %v2571_v20 = vadd.f32 %v2492_v51, %v2210_v26  ;;  %v2212_v45 = vpop.f32.mrf.mxu1  ;;  %v3774_v26 = vld [vmem:[#allocation2 + $0xe0] sm:$0xff] }
 0x340   : > { %v2213_v50 = vadd.f32 %v2212_v45, %v1979_v44  ;;  %v3750_v51 = vld [vmem:[#allocation2 + $0x60] sm:$0xff] }
 0x341   : > { %v2886_v49 = vadd.f32 %v2807_v41, %v2571_v20  ;;  %2018 = vmatmul.bf16.gmra.mxu0 %v3771_v42  ;;  %v3798_v20 = vld [vmem:[#allocation2 + $0x160] sm:$0xff] }
 0x342   : > { %2251 = vmatmul.bf16.gmra.mxu1 %v3747_v43  ;;  %v3822_v44 = vld [vmem:[#allocation2 + $0x1e0] sm:$0xff] }
 0x343   : > { %v2922_v38 = vadd.f32 %v4906_v35, %v2886_v49  ;;  %2534 = vmatmul.bf16.gmra.mxu2 %v3795_v46 }
 0x344   : > { %2849 = vmatmul.bf16.gmra.mxu3 %v3819_v58 }
 0x345   : > { %2954 = vst [vmem:[#allocation10 + $0x8] sm:$0xff] %v2922_v38 }
 0x346   : > { %v2495_v40 = vpop.f32.mrf.mxu2  ;;  %v1981_v2 = vpop.f32.mrf.mxu0 }
 0x347   : > { %v2810_v52 = vpop.f32.mrf.mxu3  ;;  %v2572_v1 = vadd.f32 %v2495_v40, %v2213_v50  ;;  %v2214_v54 = vpop.f32.mrf.mxu1 }
 0x348   : > { %v2215_v57 = vadd.f32 %v2214_v54, %v1981_v2 }
 0x349   : > { %v2887_v55 = vadd.f32 %v2810_v52, %v2572_v1 }
 0x34b   : > { %v2923_v56 = vadd.f32 %v4906_v35, %v2887_v55 }
 0x34d   : > { %2955 = vst [vmem:[#allocation10 + $0x10] sm:$0xff] %v2923_v56 }
 0x34e   : > { %v2497_v59 = vpop.f32.mrf.mxu2  ;;  %v1984_v0 = vpop.f32.mrf.mxu0 }
 0x34f   : > { %v2812_v62 = vpop.f32.mrf.mxu3  ;;  %v2573_v63 = vadd.f32 %v2497_v59, %v2215_v57  ;;  %v2217_v21 = vpop.f32.mrf.mxu1  ;;  %v3775_v57 = vld [vmem:[#allocation2 + $0xe8] sm:$0xff] }
 0x350   : > { %v2218_v9 = vadd.f32 %v2217_v21, %v1984_v0  ;;  %v3751_v59 = vld [vmem:[#allocation2 + $0x68] sm:$0xff] }
 0x351   : > { %v2888_v7 = vadd.f32 %v2812_v62, %v2573_v63  ;;  %2023 = vmatmul.bf16.gmra.mxu0 %v3772_v47  ;;  %v3799_v63 = vld [vmem:[#allocation2 + $0x168] sm:$0xff] }
 0x352   : > { %2256 = vmatmul.bf16.gmra.mxu1 %v3748_v14  ;;  %v3823_v0 = vld [vmem:[#allocation2 + $0x1e8] sm:$0xff] }
 0x353   : > { %v2924_v8 = vadd.f32 %v4906_v35, %v2888_v7  ;;  %2539 = vmatmul.bf16.gmra.mxu2 %v3796_v5 }
 0x354   : > { %2854 = vmatmul.bf16.gmra.mxu3 %v3820_v6 }
 0x355   : > { %2956 = vst [vmem:[#allocation10 + $0x18] sm:$0xff] %v2924_v8 }
 0x356   : > { %v2500_v10 = vpop.f32.mrf.mxu2  ;;  %v1986_v53 = vpop.f32.mrf.mxu0 }
 0x357   : > { %v2815_v48 = vpop.f32.mrf.mxu3  ;;  %v2574_v11 = vadd.f32 %v2500_v10, %v2218_v9  ;;  %v2219_v61 = vpop.f32.mrf.mxu1 }
 0x358   : > { %v2220_v17 = vadd.f32 %v2219_v61, %v1986_v53 }
 0x359   : > { %v2889_v12 = vadd.f32 %v2815_v48, %v2574_v11 }
 0x35b   : > { %v2925_v16 = vadd.f32 %v4906_v35, %v2889_v12 }
 0x35d   : > { %2957 = vst [vmem:[#allocation10 + $0x20] sm:$0xff] %v2925_v16 }
 0x35e   : > { %v2502_v19 = vpop.f32.mrf.mxu2  ;;  %v1989_v15 = vpop.f32.mrf.mxu0 }
 0x35f   : > { %v2817_v18 = vpop.f32.mrf.mxu3  ;;  %v2575_v24 = vadd.f32 %v2502_v19, %v2220_v17  ;;  %v2222_v25 = vpop.f32.mrf.mxu1  ;;  %v3776_v17 = vld [vmem:[#allocation2 + $0xf0] sm:$0xff] }
 0x360   : > { %v2223_v28 = vadd.f32 %v2222_v25, %v1989_v15  ;;  %v3752_v19 = vld [vmem:[#allocation2 + $0x70] sm:$0xff] }
 0x361   : > { %v2890_v13 = vadd.f32 %v2817_v18, %v2575_v24  ;;  %2028 = vmatmul.bf16.gmra.mxu0 %v3773_v60  ;;  %v3800_v24 = vld [vmem:[#allocation2 + $0x170] sm:$0xff] }
 0x362   : > { %2261 = vmatmul.bf16.gmra.mxu1 %v3749_v23  ;;  %v3824_v15 = vld [vmem:[#allocation2 + $0x1f0] sm:$0xff] }
 0x363   : > { %v2926_v27 = vadd.f32 %v4906_v35, %v2890_v13  ;;  %2544 = vmatmul.bf16.gmra.mxu2 %v3797_v3 }
 0x364   : > { %2859 = vmatmul.bf16.gmra.mxu3 %v3821_v22 }
 0x365   : > { %2958 = vst [vmem:[#allocation10 + $0x28] sm:$0xff] %v2926_v27 }
 0x366   : > { %v2505_v30 = vpop.f32.mrf.mxu2  ;;  %v1991_v31 = vpop.f32.mrf.mxu0 }
 0x367   : > { %v2820_v32 = vpop.f32.mrf.mxu3  ;;  %v2576_v33 = vadd.f32 %v2505_v30, %v2223_v28  ;;  %v2224_v34 = vpop.f32.mrf.mxu1 }
 0x368   : > { %v2225_v37 = vadd.f32 %v2224_v34, %v1991_v31 }
 0x369   : > { %v2891_v4 = vadd.f32 %v2820_v32, %v2576_v33 }
 0x36b   : > { %v2927_v36 = vadd.f32 %v4906_v35, %v2891_v4 }
 0x36d   : > { %2959 = vst [vmem:[#allocation10 + $0x30] sm:$0xff] %v2927_v36 }
 0x36e   : > { %v2507_v39 = vpop.f32.mrf.mxu2  ;;  %v1994_v42 = vpop.f32.mrf.mxu0 }
 0x36f   : > { %v2822_v29 = vpop.f32.mrf.mxu3  ;;  %v2577_v41 = vadd.f32 %v2507_v39, %v2225_v37  ;;  %v2227_v43 = vpop.f32.mrf.mxu1  ;;  %v3777_v37 = vld [vmem:[#allocation2 + $0xf8] sm:$0xff] }
 0x370   : > { %v2228_v58 = vadd.f32 %v2227_v43, %v1994_v42  ;;  %v3753_v39 = vld [vmem:[#allocation2 + $0x78] sm:$0xff] }
 0x371   : > { %v2892_v45 = vadd.f32 %v2822_v29, %v2577_v41  ;;  %2033 = vmatmul.bf16.gmra.mxu0 %v3774_v26  ;;  %v3801_v41 = vld [vmem:[#allocation2 + $0x178] sm:$0xff] }
 0x372   : > { %2266 = vmatmul.bf16.gmra.mxu1 %v3750_v51  ;;  %v3825_v42 = vld [vmem:[#allocation2 + $0x1f8] sm:$0xff] }
 0x373   : > { %v2928_v46 = vadd.f32 %v4906_v35, %v2892_v45  ;;  %2549 = vmatmul.bf16.gmra.mxu2 %v3798_v20 }
 0x374   : > { %2864 = vmatmul.bf16.gmra.mxu3 %v3822_v44 }
 0x375   : > { %2960 = vst [vmem:[#allocation10 + $0x38] sm:$0xff] %v2928_v46 }
 0x376   : > { %v2510_v49 = vpop.f32.mrf.mxu2  ;;  %v1996_v40 = vpop.f32.mrf.mxu0 }
 0x377   : > { %v2825_v38 = vpop.f32.mrf.mxu3  ;;  %v2578_v50 = vadd.f32 %v2510_v49, %v2228_v58  ;;  %v2229_v52 = vpop.f32.mrf.mxu1 }
 0x378   : > { %v2230_v54 = vadd.f32 %v2229_v52, %v1996_v40 }
 0x379   : > { %v2893_v1 = vadd.f32 %v2825_v38, %v2578_v50 }
 0x37b   : > { %v2929_v2 = vadd.f32 %v4906_v35, %v2893_v1 }
 0x37d   : > { %2961 = vst [vmem:[#allocation10 + $0x40] sm:$0xff] %v2929_v2 }
 0x37e   : > { %v2512_v55 = vpop.f32.mrf.mxu2  ;;  %v1999_v47 = vpop.f32.mrf.mxu0 }
 0x37f   : > { %v2827_v56 = vpop.f32.mrf.mxu3  ;;  %v2579_v62 = vadd.f32 %v2512_v55, %v2230_v54  ;;  %v2232_v14 = vpop.f32.mrf.mxu1 }
 0x380   : > { %v2233_v6 = vadd.f32 %v2232_v14, %v1999_v47 }
 0x381   : > { %v2894_v21 = vadd.f32 %v2827_v56, %v2579_v62  ;;  %2038 = vmatmul.bf16.gmra.mxu0 %v3775_v57 }
 0x382   : > { %2271 = vmatmul.bf16.gmra.mxu1 %v3751_v59 }
 0x383   : > { %v2930_v5 = vadd.f32 %v4906_v35, %v2894_v21  ;;  %2554 = vmatmul.bf16.gmra.mxu2 %v3799_v63 }
 0x384   : > { %2869 = vmatmul.bf16.gmra.mxu3 %v3823_v0 }
 0x385   : > { %2962 = vst [vmem:[#allocation10 + $0x48] sm:$0xff] %v2930_v5 }
 0x386   : > { %v2515_v7 = vpop.f32.mrf.mxu2  ;;  %v2001_v10 = vpop.f32.mrf.mxu0 }
 0x387   : > { %v2830_v8 = vpop.f32.mrf.mxu3  ;;  %v2580_v9 = vadd.f32 %v2515_v7, %v2233_v6  ;;  %v2234_v48 = vpop.f32.mrf.mxu1 }
 0x388   : > { %v2235_v61 = vadd.f32 %v2234_v48, %v2001_v10 }
 0x389   : > { %v2895_v11 = vadd.f32 %v2830_v8, %v2580_v9 }
 0x38b   : > { %v2931_v53 = vadd.f32 %v4906_v35, %v2895_v11 }
 0x38d   : > { %2963 = vst [vmem:[#allocation10 + $0x50] sm:$0xff] %v2931_v53 }
 0x38e   : > { %v2517_v12 = vpop.f32.mrf.mxu2  ;;  %v2004_v60 = vpop.f32.mrf.mxu0 }
 0x38f   : > { %v2832_v16 = vpop.f32.mrf.mxu3  ;;  %v2581_v18 = vadd.f32 %v2517_v12, %v2235_v61  ;;  %v2237_v23 = vpop.f32.mrf.mxu1 }
 0x390   : > { %v2238_v22 = vadd.f32 %v2237_v23, %v2004_v60 }
 0x391   : > { %v2896_v25 = vadd.f32 %v2832_v16, %v2581_v18  ;;  %2043 = vmatmul.bf16.gmra.mxu0 %v3776_v17 }
 0x392   : > { %2276 = vmatmul.bf16.gmra.mxu1 %v3752_v19 }
 0x393   : > { %v2932_v3 = vadd.f32 %v4906_v35, %v2896_v25  ;;  %2559 = vmatmul.bf16.gmra.mxu2 %v3800_v24 }
 0x394   : > { %2874 = vmatmul.bf16.gmra.mxu3 %v3824_v15 }
 0x395   : > { %2964 = vst [vmem:[#allocation10 + $0x58] sm:$0xff] %v2932_v3 }
 0x396   : > { %v2520_v13 = vpop.f32.mrf.mxu2  ;;  %v2006_v30 = vpop.f32.mrf.mxu0 }
 0x397   : > { %v2835_v27 = vpop.f32.mrf.mxu3  ;;  %v2582_v28 = vadd.f32 %v2520_v13, %v2238_v22  ;;  %v2239_v32 = vpop.f32.mrf.mxu1 }
 0x398   : > { %v2240_v34 = vadd.f32 %v2239_v32, %v2006_v30 }
 0x399   : > { %v2897_v33 = vadd.f32 %v2835_v27, %v2582_v28 }
 0x39b   : > { %v2933_v31 = vadd.f32 %v4906_v35, %v2897_v33 }
 0x39d   : > { %2965 = vst [vmem:[#allocation10 + $0x60] sm:$0xff] %v2933_v31 }
 0x39e   : > { %v2522_v4 = vpop.f32.mrf.mxu2  ;;  %v2009_v26 = vpop.f32.mrf.mxu0 }
 0x39f   : > { %v2837_v36 = vpop.f32.mrf.mxu3  ;;  %v2583_v29 = vadd.f32 %v2522_v4, %v2240_v34  ;;  %v2242_v51 = vpop.f32.mrf.mxu1 }
 0x3a0   : > { %v2243_v44 = vadd.f32 %v2242_v51, %v2009_v26 }
 0x3a1   : > { %v2898_v43 = vadd.f32 %v2837_v36, %v2583_v29  ;;  %2048 = vmatmul.bf16.gmra.mxu0 %v3777_v37 }
 0x3a2   : > { %2281 = vmatmul.bf16.gmra.mxu1 %v3753_v39 }
 0x3a3   : > { %v2934_v20 = vadd.f32 %v4906_v35, %v2898_v43  ;;  %2564 = vmatmul.bf16.gmra.mxu2 %v3801_v41 }
 0x3a4   : > { %2879 = vmatmul.bf16.gmra.mxu3 %v3825_v42 }
 0x3a5   : > { %2966 = vst [vmem:[#allocation10 + $0x68] sm:$0xff] %v2934_v20 }
 0x3a6   : > { %v2525_v45 = vpop.f32.mrf.mxu2  ;;  %v2011_v49 = vpop.f32.mrf.mxu0 }
 0x3a7   : > { %v2840_v46 = vpop.f32.mrf.mxu3  ;;  %v2584_v58 = vadd.f32 %v2525_v45, %v2243_v44  ;;  %v2244_v38 = vpop.f32.mrf.mxu1 }
 0x3a8   : > { %v2245_v52 = vadd.f32 %v2244_v38, %v2011_v49 }
 0x3a9   : > { %v2899_v50 = vadd.f32 %v2840_v46, %v2584_v58 }
 0x3ab   : > { %v2935_v40 = vadd.f32 %v4906_v35, %v2899_v50 }
 0x3ad   : > { %2967 = vst [vmem:[#allocation10 + $0x70] sm:$0xff] %v2935_v40 }
 0x3ae   : > { %v2527_v1 = vpop.f32.mrf.mxu2  ;;  %v2014_v55 = vpop.f32.mrf.mxu0 }
 0x3af   : > { %v2842_v2 = vpop.f32.mrf.mxu3  ;;  %v2585_v54 = vadd.f32 %v2527_v1, %v2245_v52  ;;  %v2247_v56 = vpop.f32.mrf.mxu1 }
 0x3b0   : > { %v2248_v62 = vadd.f32 %v2247_v56, %v2014_v55 }
 0x3b1   : > { %v2900_v57 = vadd.f32 %v2842_v2, %v2585_v54 }
 0x3b3   : > { %v2936_v59 = vadd.f32 %v4906_v35, %v2900_v57 }
 0x3b5   : > { %2968 = vst [vmem:[#allocation10 + $0x78] sm:$0xff] %v2936_v59 }
 0x3b6   : > { %v2530_v47 = vpop.f32.mrf.mxu2  ;;  %v2016_v0 = vpop.f32.mrf.mxu0 }
 0x3b7   : > { %v2845_v14 = vpop.f32.mrf.mxu3  ;;  %v2586_v63 = vadd.f32 %v2530_v47, %v2248_v62  ;;  %v2249_v21 = vpop.f32.mrf.mxu1 }
 0x3b8   : > { %v2250_v7 = vadd.f32 %v2249_v21, %v2016_v0 }
 0x3b9   : > { %v2901_v5 = vadd.f32 %v2845_v14, %v2586_v63 }
 0x3bb   : > { %v2937_v6 = vadd.f32 %v4906_v35, %v2901_v5 }
 0x3bd   : > { %2969 = vst [vmem:[#allocation10 + $0x80] sm:$0xff] %v2937_v6 }
 0x3be   : > { %v2532_v8 = vpop.f32.mrf.mxu2  ;;  %v2019_v48 = vpop.f32.mrf.mxu0 }
 0x3bf   : > { %v2847_v9 = vpop.f32.mrf.mxu3  ;;  %v2587_v10 = vadd.f32 %v2532_v8, %v2250_v7  ;;  %v2252_v11 = vpop.f32.mrf.mxu1 }
 0x3c0   : > { %v2253_v12 = vadd.f32 %v2252_v11, %v2019_v48 }
 0x3c1   : > { %v2902_v53 = vadd.f32 %v2847_v9, %v2587_v10 }
 0x3c3   : > { %v2938_v61 = vadd.f32 %v4906_v35, %v2902_v53 }
 0x3c5   : > { %2970 = vst [vmem:[#allocation10 + $0x88] sm:$0xff] %v2938_v61 }
 0x3c6   : > { %v2535_v16 = vpop.f32.mrf.mxu2  ;;  %v2021_v18 = vpop.f32.mrf.mxu0 }
 0x3c7   : > { %v2850_v17 = vpop.f32.mrf.mxu3  ;;  %v2588_v19 = vadd.f32 %v2535_v16, %v2253_v12  ;;  %v2254_v60 = vpop.f32.mrf.mxu1 }
 0x3c8   : > { %v2255_v15 = vadd.f32 %v2254_v60, %v2021_v18 }
 0x3c9   : > { %v2903_v23 = vadd.f32 %v2850_v17, %v2588_v19 }
 0x3cb   : > { %v2939_v24 = vadd.f32 %v4906_v35, %v2903_v23 }
 0x3cd   : > { %2971 = vst [vmem:[#allocation10 + $0x90] sm:$0xff] %v2939_v24 }
 0x3ce   : > { %v2537_v25 = vpop.f32.mrf.mxu2  ;;  %v2024_v13 = vpop.f32.mrf.mxu0 }
 0x3cf   : > { %v2852_v3 = vpop.f32.mrf.mxu3  ;;  %v2589_v22 = vadd.f32 %v2537_v25, %v2255_v15  ;;  %v2257_v27 = vpop.f32.mrf.mxu1 }
 0x3d0   : > { %v2258_v32 = vadd.f32 %v2257_v27, %v2024_v13 }
 0x3d1   : > { %v2904_v28 = vadd.f32 %v2852_v3, %v2589_v22 }
 0x3d3   : > { %v2940_v30 = vadd.f32 %v4906_v35, %v2904_v28 }
 0x3d5   : > { %2972 = vst [vmem:[#allocation10 + $0x98] sm:$0xff] %v2940_v30 }
 0x3d6   : > { %v2540_v33 = vpop.f32.mrf.mxu2  ;;  %v2026_v4 = vpop.f32.mrf.mxu0 }
 0x3d7   : > { %v2855_v31 = vpop.f32.mrf.mxu3  ;;  %v2590_v34 = vadd.f32 %v2540_v33, %v2258_v32  ;;  %v2259_v36 = vpop.f32.mrf.mxu1 }
 0x3d8   : > { %v2260_v29 = vadd.f32 %v2259_v36, %v2026_v4 }
 0x3d9   : > { %v2905_v37 = vadd.f32 %v2855_v31, %v2590_v34 }
 0x3db   : > { %v2941_v39 = vadd.f32 %v4906_v35, %v2905_v37 }
 0x3dd   : > { %2973 = vst [vmem:[#allocation10 + $0xa0] sm:$0xff] %v2941_v39 }
 0x3de   : > { %v2542_v26 = vpop.f32.mrf.mxu2  ;;  %v2029_v42 = vpop.f32.mrf.mxu0 }
 0x3df   : > { %v2857_v51 = vpop.f32.mrf.mxu3  ;;  %v2591_v41 = vadd.f32 %v2542_v26, %v2260_v29  ;;  %v2262_v43 = vpop.f32.mrf.mxu1 }
 0x3e0   : > { %v2263_v45 = vadd.f32 %v2262_v43, %v2029_v42 }
 0x3e1   : > { %v2906_v20 = vadd.f32 %v2857_v51, %v2591_v41 }
 0x3e3   : > { %v2942_v44 = vadd.f32 %v4906_v35, %v2906_v20 }
 0x3e5   : > { %2974 = vst [vmem:[#allocation10 + $0xa8] sm:$0xff] %v2942_v44 }
 0x3e6   : > { %v2545_v46 = vpop.f32.mrf.mxu2  ;;  %v2031_v38 = vpop.f32.mrf.mxu0 }
 0x3e7   : > { %v2860_v58 = vpop.f32.mrf.mxu3  ;;  %v2592_v49 = vadd.f32 %v2545_v46, %v2263_v45  ;;  %v2264_v50 = vpop.f32.mrf.mxu1 }
 0x3e8   : > { %v2265_v1 = vadd.f32 %v2264_v50, %v2031_v38 }
 0x3e9   : > { %v2907_v40 = vadd.f32 %v2860_v58, %v2592_v49 }
 0x3eb   : > { %v2943_v52 = vadd.f32 %v4906_v35, %v2907_v40 }
 0x3ed   : > { %2975 = vst [vmem:[#allocation10 + $0xb0] sm:$0xff] %v2943_v52 }
 0x3ee   : > { %v2547_v2 = vpop.f32.mrf.mxu2  ;;  %v2034_v56 = vpop.f32.mrf.mxu0 }
 0x3ef   : > { %v2862_v54 = vpop.f32.mrf.mxu3  ;;  %v2593_v55 = vadd.f32 %v2547_v2, %v2265_v1  ;;  %v2267_v57 = vpop.f32.mrf.mxu1 }
 0x3f0   : > { %v2268_v47 = vadd.f32 %v2267_v57, %v2034_v56 }
 0x3f1   : > { %v2908_v59 = vadd.f32 %v2862_v54, %v2593_v55 }
 0x3f3   : > { %v2944_v62 = vadd.f32 %v4906_v35, %v2908_v59 }
 0x3f5   : > { %2976 = vst [vmem:[#allocation10 + $0xb8] sm:$0xff] %v2944_v62 }
 0x3f6   : > { %v2550_v14 = vpop.f32.mrf.mxu2  ;;  %v2036_v21 = vpop.f32.mrf.mxu0 }
 0x3f7   : > { %v2865_v63 = vpop.f32.mrf.mxu3  ;;  %v2594_v0 = vadd.f32 %v2550_v14, %v2268_v47  ;;  %v2269_v5 = vpop.f32.mrf.mxu1 }
 0x3f8   : > { %v2270_v8 = vadd.f32 %v2269_v5, %v2036_v21 }
 0x3f9   : > { %v2909_v6 = vadd.f32 %v2865_v63, %v2594_v0 }
 0x3fb   : > { %v2945_v7 = vadd.f32 %v4906_v35, %v2909_v6 }
 0x3fd   : > { %2977 = vst [vmem:[#allocation10 + $0xc0] sm:$0xff] %v2945_v7 }
 0x3fe   : > { %v2552_v9 = vpop.f32.mrf.mxu2  ;;  %v2039_v11 = vpop.f32.mrf.mxu0 }
 0x3ff   : > { %v2867_v10 = vpop.f32.mrf.mxu3  ;;  %v2595_v48 = vadd.f32 %v2552_v9, %v2270_v8  ;;  %v2272_v53 = vpop.f32.mrf.mxu1 }
 0x400   : > { %v2273_v16 = vadd.f32 %v2272_v53, %v2039_v11 }
 0x401   : > { %v2910_v61 = vadd.f32 %v2867_v10, %v2595_v48 }
 0x403   : > { %v2946_v12 = vadd.f32 %v4906_v35, %v2910_v61 }
 0x405   : > { %2978 = vst [vmem:[#allocation10 + $0xc8] sm:$0xff] %v2946_v12 }
 0x406   : > { %v2555_v17 = vpop.f32.mrf.mxu2  ;;  %v2041_v60 = vpop.f32.mrf.mxu0 }
 0x407   : > { %v2870_v19 = vpop.f32.mrf.mxu3  ;;  %v2596_v18 = vadd.f32 %v2555_v17, %v2273_v16  ;;  %v2274_v23 = vpop.f32.mrf.mxu1 }
 0x408   : > { %v2275_v25 = vadd.f32 %v2274_v23, %v2041_v60 }
 0x409   : > { %v2911_v24 = vadd.f32 %v2870_v19, %v2596_v18 }
 0x40b   : > { %v2947_v15 = vadd.f32 %v4906_v35, %v2911_v24 }
 0x40d   : > { %2979 = vst [vmem:[#allocation10 + $0xd0] sm:$0xff] %v2947_v15 }
 0x40e   : > { %v2557_v3 = vpop.f32.mrf.mxu2  ;;  %v2044_v27 = vpop.f32.mrf.mxu0 }
 0x40f   : > { %v2872_v22 = vpop.f32.mrf.mxu3  ;;  %v2597_v13 = vadd.f32 %v2557_v3, %v2275_v25  ;;  %v2277_v28 = vpop.f32.mrf.mxu1 }
 0x410   : > { %v2278_v33 = vadd.f32 %v2277_v28, %v2044_v27 }
 0x411   : > { %v2912_v30 = vadd.f32 %v2872_v22, %v2597_v13 }
 0x413   : > { %v2948_v32 = vadd.f32 %v4906_v35, %v2912_v30 }
 0x415   : > { %2980 = vst [vmem:[#allocation10 + $0xd8] sm:$0xff] %v2948_v32 }
 0x416   : > { %v2560_v31 = vpop.f32.mrf.mxu2  ;;  %v2046_v36 = vpop.f32.mrf.mxu0 }
 0x417   : > { %v2875_v34 = vpop.f32.mrf.mxu3  ;;  %v2598_v4 = vadd.f32 %v2560_v31, %v2278_v33  ;;  %v2279_v37 = vpop.f32.mrf.mxu1 }
 0x418   : > { %v2280_v26 = vadd.f32 %v2279_v37, %v2046_v36 }
 0x419   : > { %v2913_v39 = vadd.f32 %v2875_v34, %v2598_v4 }
 0x41b   : > { %v2949_v29 = vadd.f32 %v4906_v35, %v2913_v39 }
 0x41d   : > { %2981 = vst [vmem:[#allocation10 + $0xe0] sm:$0xff] %v2949_v29 }
 0x41e   : > { %v2562_v51 = vpop.f32.mrf.mxu2  ;;  %v2049_v43 = vpop.f32.mrf.mxu0 }
 0x41f   : > { %v2877_v41 = vpop.f32.mrf.mxu3  ;;  %v2599_v42 = vadd.f32 %v2562_v51, %v2280_v26  ;;  %v2282_v20 = vpop.f32.mrf.mxu1 }
 0x420   : > { %v2283_v46 = vadd.f32 %v2282_v20, %v2049_v43 }
 0x421   : > { %v2914_v44 = vadd.f32 %v2877_v41, %v2599_v42 }
 0x423   : > { %v2950_v45 = vadd.f32 %v4906_v35, %v2914_v44 }
 0x425   : > { %2982 = vst [vmem:[#allocation10 + $0xe8] sm:$0xff] %v2950_v45 }
 0x426   : > { %v2565_v58 = vpop.f32.mrf.mxu2  ;;  %v2051_v40 = vpop.f32.mrf.mxu0 }
 0x427   : > { %v2880_v49 = vpop.f32.mrf.mxu3  ;;  %v2600_v38 = vadd.f32 %v2565_v58, %v2283_v46  ;;  %v2284_v52 = vpop.f32.mrf.mxu1 }
 0x428   : > { %v2285_v2 = vadd.f32 %v2284_v52, %v2051_v40 }
 0x429   : > { %v2915_v50 = vadd.f32 %v2880_v49, %v2600_v38 }
 0x42b   : > { %v2951_v1 = vadd.f32 %v4906_v35, %v2915_v50 }
 0x42d   : > { %2983 = vst [vmem:[#allocation10 + $0xf0] sm:$0xff] %v2951_v1 }
 0x42e   : > { %v2567_v54 = vpop.f32.mrf.mxu2 }
 0x42f   : > { %v2601_v55 = vadd.f32 %v2567_v54, %v2285_v2  ;;  %v2882_v56 = vpop.f32.mrf.mxu3 }
 0x431   : > { %v2916_v57 = vadd.f32 %v2882_v56, %v2601_v55 }
 0x433   : > { %v2952_v59 = vadd.f32 %v4906_v35, %v2916_v57 }
 0x435   : > { %2984 = vst [vmem:[#allocation10 + $0xf8] sm:$0xff] %v2952_v59 }
 0x436 PF: > { %s3834_s18 = sshll.u32 %s4390_s9, 8  ;;  %s2998_s0 = sshll.u32 %s4499_s11, 4  ;;  %s2999_s0 = int_to_ptr.vmem [resolvable:$true] %s2998_s0 }
 0x437   : > { %s2997_s17 = scalar_lea.hbm %s4989_s7, %s3834_s18  ;;  %s2986_s14 = scalar_lea.sflag [#allocation5], %s4477_s19 }
 0x438   : > { %s3000_s23 = sshll.u32 %s2997_s17, 4  ;;  %s4226_s26 = scalar_lea.hbm %s4989_s7, 768  ;;  %s3001_s23 = int_to_ptr.hbm [resolvable:$true] %s3000_s23 }
 0x439   : > { %s4220_s22 = sshra.s32 %s3001_s23, 4  ;;  %s4221_s22 = int_to_ptr.hbm [resolvable:$true] %s4220_s22 }
 0x43a   : > { %s4222_s21 = scalar_lea.hbm %s4221_s22, 256  ;;  %p4227_p11 = scmp.lt.s32.totalorder %s4221_s22, %s4989_s7 }
 0x43b   : > { %p4223_p8 = scmp.ne.s32.totalorder %s4221_s22, %s4222_s21  ;;  %p4228_p12 = scmp.lt.s32.totalorder %s4226_s26, %s4222_s21 }
 0x43d   : > { %p4224_p9 = pnand %p4223_p8, %p4441_p3  ;;  %p4229_p13 = por %p4228_p12, %p4227_p11 }
 0x43f   : > { %p4225_p10 = pneg %p4224_p9 }
 0x441   : > { %p4230_p0 = pnand %p4229_p13, %p4225_p10 }
 0x443   : > { %4233 = shalt.err (!%p4230_p0)
}
 0x444   : > { %s4321_s19 = smov 128   ;;  %s4322_s11 = smov 8  }
 0x445   : > { %4036 = dma.vmem_to_hbm [thread:$0]  (%p4441_p3), %s2999_s0, 4096, %s3001_s23, %s2986_s14, %s4321_s19, %s4321_s19, %s4322_s11  }
 0x446   : > { %s4323_s18 = smov [#allocation10]   ;;  %s3014_s25 = sshll.u32 %s4990_s8, 4  ;;  %s3015_s25 = int_to_ptr.hbm [resolvable:$true] %s3014_s25 }
 0x447   : > { %s3012_s5 = sshll.u32 %s4323_s18, 4  ;;  %p5007_p5 = scmp.eq.s32.totalorder %s4390_s9, 2  ;;  %s3013_s5 = int_to_ptr.vmem [resolvable:$true] %s3012_s5 }
 0x449   : > { %4038 = dma.vmem_to_hbm [thread:$0]  (%p5007_p5), %s3013_s5, 4096, %s3015_s25, [#allocation11], %s4321_s19, %s4321_s19, %s4322_s11  }
 0x44a   : > { %p5008_p7 = pmov %p5007_p5 }
 0x44b   : > { %p5009_p2 = pmov %p5007_p5 }
 0x44c   : > { %4291 = dma.done.wait (%p5008_p7), [#allocation11], 4096  }
 0x44d   : > { %4293 = vsyncadd (%p5009_p2), [#allocation11], 4294963200 }
 0x44e PF: > { %p4064_p3 = scmp.ge.s32.totalorder %s4312_s30, 2  ;;  %s3034_s15 = sand.u32 1, %s4300_s27  }
 0x44f   : > { %s3035_s0 = scalar_lea.sflag [#allocation5], %s3034_s15 }
 0x450   : > { %p4054_p4 = pnand %p4064_p3, %p4404_p6 }
 0x452   : > { %p4055_p1 = pneg %p4054_p4 }
 0x454   : > { %4295 = dma.done.wait (%p4055_p1), %s3035_s0, 4096  }
 0x455   : > { %4297 = vsyncadd (%p4055_p1), %s3035_s0, 4294963200  ;;  %s5010_s23 = sld [smem:[#allocation17_spill]]  ;;  %p24_p8 = scmp.ge.s32.totalorder %s4428_s13, 5  }
 0x456   : > { %s5011_s27 = smov %s4304_s28  ;;  %s5012_s28 = smov %s4308_s29 }
 0x457   : > { %s5014_s30 = smov %s4428_s13  ;;  %26 = sbr.rel (!%p24_p8) target bundleno = 10 (0xa), region = 129 }
 0x45b   : > { %s5013_s29 = smov %s5010_s23 }
 0x45c   :  { %3041 = vsyncpa [#allocation4], 1 }
 0x45d   :  { %3043 = vsyncpa [#allocation4 + $0x1], 1 }
 0x45e   :  { %3044 = vsyncpa [#allocation7], 1 }
 0x45f   :  { %3046 = vsyncpa [#allocation7 + $0x1], 1 }
 0x460   :  { %3047 = vsyncpa [#allocation5], 1 }
 0x461   :  { %3049 = vsyncpa [#allocation5 + $0x1], 1 }
 0x462   :  { %3050 = vsyncpa [#allocation11], 1 }

</bundles_post_ra>
